<compile_context>
chip_gen: v5e
topology: v5e:2x2
jax: 0.10.0
libtpu: 0.0.40
codegen_flags: <defaults>
</compile_context>

<pallas_src>
import functools

import jax
import jax.numpy as jnp
import numpy as np
from jax import lax
from jax.experimental import pallas as pl
from jax.experimental.pallas import tpu as pltpu

BASEWIDTH = 64
CARDINALITY = 32
DEPTH = 4
BN_EPS = 1e-5


# ------------------------------ fused kernel -------------------------------- #
def _fused_bottleneck_kernel(ph_ref, mask_ref, a1_ref, b1_ref, w2f_ref, b2_ref,
                             wcat_ref, bcat_ref, o_ref, *, stride, ho, wo, pack):
    """One batch image per grid step.

    ph_ref   : (stride*stride, Pr, Pc, Cin)  zero-padded, stride-phase-decomposed x
    mask_ref : (9, ho, wo, 1)   1.0 where a 3x3 tap hits a valid (non-pad) h1 cell
    a1 / b1  : (1, 1, cd)       stage-1 per-channel scale / bias (conv1 diag * BN1)
    w2f      : (9, 1, 1, cd)    depthwise 3x3 tap weights with BN2 scale folded in
    b2       : (1, 1, cd)       BN2 bias
    wcat     : (cd + Cin, out4) [w3 * bn3_scale ; w_shortcut * bn_sc_scale]
    bcat     : (1, out4)        bn3_bias + bn_sc_bias
    o_ref    : (ho*wo//pack, out4*pack)  lane-dense packed output
    """
    s = stride
    a1 = a1_ref[...]
    b1 = b1_ref[...]
    cd = a1.shape[-1]

    # stage 1 (per-channel scale+bias+relu) + stage 2 (depthwise 3x3 + BN + relu)
    # accumulated tap by tap on the VPU -- no MXU work, no zero-padded weights.
    acc = jnp.zeros((ho, wo, cd), jnp.float32)
    t = 0
    for dy in range(3):
        for dx in range(3):
            p = (dy % s) * s + (dx % s)
            xt = ph_ref[p, dy // s:dy // s + ho, dx // s:dx // s + wo, :]
            h1t = jnp.maximum(xt * a1 + b1, 0.0) * mask_ref[t]
            acc = acc + h1t * w2f_ref[t]
            t += 1
    h2 = jnp.maximum(acc + b2_ref[...], 0.0)                      # (ho, wo, cd)

    # shortcut input = x at the strided centers (same positions as tap (1,1);
    # always valid, never padding).
    p_ctr = (1 % s) * s + (1 % s)
    xs = ph_ref[p_ctr, 1 // s:1 // s + ho, 1 // s:1 // s + wo, :]  # (ho, wo, Cin)

    # stage 3 + shortcut projection merged into ONE MXU matmul along K,
    # BN scales already folded into wcat.
    lhs = jnp.concatenate([h2.reshape(ho * wo, cd),
                           xs.reshape(ho * wo, xs.shape[-1])], axis=-1)
    y = jnp.dot(lhs, wcat_ref[...], preferred_element_type=jnp.float32)
    y = jnp.maximum(y + bcat_ref[...], 0.0)                        # (ho*wo, out4)

    # pack to a 128-lane-dense slab: row block i of y goes to lane block i.
    if pack > 1:
        rows = (ho * wo) // pack
        y = jnp.concatenate(
            [y[i * rows:(i + 1) * rows, :] for i in range(pack)], axis=-1)
    o_ref[...] = y.astype(o_ref.dtype)


# ------------------------- parameter glue (plain JAX) ----------------------- #
def fold_bn(gamma, beta, mean, var, eps=BN_EPS):
    inv = gamma / jnp.sqrt(var + eps)
    return inv, beta - mean * inv


# ------------------------------ forward pass -------------------------------- #
def resnext_bottleneck_forward(x_nchw, params, stride):
    n, cin, h, w = x_nchw.shape
    w1, w2, w3 = params["w1"], params["w2"], params["w3"]
    cd = w1.shape[0]
    out4 = w3.shape[0]
    s = int(stride)
    ho = (h - 1) // s + 1
    wo = (w - 1) // s + 1

    # degenerate grouped structure exploited by the fused kernel (1-in/1-out per group)
    assert cin == CARDINALITY and cd == CARDINALITY, \
        "fused kernel specializes the 1-in/1-out-per-group ResNeXt config"

    s1, b1 = fold_bn(*params["bn1"])
    s2, b2 = fold_bn(*params["bn2"])
    s3, b3 = fold_bn(*params["bn3"])

    # stage-1 grouped 1x1 conv is a diagonal -> fold its weight into BN1's scale
    a1 = (w1[:, 0, 0, 0] * s1).reshape(1, 1, cd)
    b1r = b1.reshape(1, 1, cd)

    # stage-2 depthwise 3x3: fold BN2 scale into the 9 per-channel tap weights
    w2f = (jnp.transpose(w2[:, 0, :, :], (1, 2, 0)).reshape(9, cd)
           * s2.reshape(1, cd)).reshape(9, 1, 1, cd)
    b2r = b2.reshape(1, 1, cd)

    # stage-3 + shortcut merged along K, BN scales folded into weight columns
    w3f = w3[:, :, 0, 0].T * s3.reshape(1, out4)                   # (cd, out4)
    if params.get("ws") is not None:
        ss, bs = fold_bn(*params["bns"])
        wsf = params["ws"][:, :, 0, 0].T * ss.reshape(1, out4)     # (cin, out4)
        bcat = (b3 + bs).reshape(1, out4)
    else:
        assert s == 1 and cin == out4
        wsf = jnp.eye(cin, dtype=x_nchw.dtype)                     # identity shortcut
        bcat = b3.reshape(1, out4)
    wcat = jnp.concatenate([w3f, wsf], axis=0)                     # (cd+cin, out4)

    # zero-pad + stride-phase decompose the NHWC input (pure layout plumbing,
    # ~1x data; replaces the old 9x im2col slab and the strided shortcut slice).
    x_nhwc = jnp.transpose(x_nchw, (0, 2, 3, 1))
    prow = -(-(h + 2) // s)
    pcol = -(-(w + 2) // s)
    xp = jnp.pad(x_nhwc,
                 ((0, 0), (1, prow * s - h - 1), (1, pcol * s - w - 1), (0, 0)))
    phases = (xp.reshape(n, prow, s, pcol, s, cin)
                .transpose(0, 2, 4, 1, 3, 5)
                .reshape(n, s * s, prow, pcol, cin))

    # static per-tap validity masks (zero where the tap would read h1's zero pad)
    valid = np.zeros((prow * s, pcol * s), np.float32)
    valid[1:h + 1, 1:w + 1] = 1.0
    mask_np = np.empty((9, ho, wo, 1), np.float32)
    t = 0
    for dy in range(3):
        for dx in range(3):
            mask_np[t, :, :, 0] = valid[dy:dy + (ho - 1) * s + 1:s,
                                        dx:dx + (wo - 1) * s + 1:s]
            t += 1
    mask = jnp.asarray(mask_np)

    # lane-dense output packing: (ho*wo, out4) -> (ho*wo/pack, out4*pack)
    if out4 < 128 and 128 % out4 == 0 and (ho * wo) % (128 // out4) == 0:
        pack = 128 // out4
    else:
        pack = 1
    pk_rows = (ho * wo) // pack
    pk_lanes = out4 * pack

    kernel = functools.partial(_fused_bottleneck_kernel,
                               stride=s, ho=ho, wo=wo, pack=pack)
    out_packed = pl.pallas_call(
        kernel,
        out_shape=jax.ShapeDtypeStruct((n, pk_rows, pk_lanes), x_nchw.dtype),
        grid_spec=pltpu.PrefetchScalarGridSpec(
            num_scalar_prefetch=0,
            grid=(n,),
            in_specs=[
                pl.BlockSpec((None, s * s, prow, pcol, cin),
                             lambda b: (b, 0, 0, 0, 0)),
                pl.BlockSpec((9, ho, wo, 1), lambda b: (0, 0, 0, 0)),
                pl.BlockSpec((1, 1, cd), lambda b: (0, 0, 0)),
                pl.BlockSpec((1, 1, cd), lambda b: (0, 0, 0)),
                pl.BlockSpec((9, 1, 1, cd), lambda b: (0, 0, 0, 0)),
                pl.BlockSpec((1, 1, cd), lambda b: (0, 0, 0)),
                pl.BlockSpec((cd + cin, out4), lambda b: (0, 0)),
                pl.BlockSpec((1, out4), lambda b: (0, 0)),
            ],
            out_specs=pl.BlockSpec((None, pk_rows, pk_lanes), lambda b: (b, 0, 0)),
        ),
        compiler_params=pltpu.CompilerParams(
            dimension_semantics=("parallel",)),
    )(phases, mask, a1, b1r, w2f, b2r, wcat, bcat)

    # unpack the lane-dense slab back to NCHW
    if pack > 1:
        out = jnp.concatenate(
            [out_packed[:, :, i * out4:(i + 1) * out4] for i in range(pack)],
            axis=1)
    else:
        out = out_packed
    return out.reshape(n, ho, wo, out4).transpose(0, 3, 1, 2)


# --------------------------- pure-JAX reference ----------------------------- #
def _bn_nchw(x, gamma, beta, mean, var, eps=BN_EPS):
    inv = gamma / jnp.sqrt(var + eps)
    return x * inv.reshape(1, -1, 1, 1) + (beta - mean * inv).reshape(1, -1, 1, 1)


def reference_forward(x, params, stride):
    dn = ("NCHW", "OIHW", "NCHW")
    hp = lax.Precision.HIGHEST
    y = lax.conv_general_dilated(x, params["w1"], (1, 1), "VALID",
                                 dimension_numbers=dn,
                                 feature_group_count=CARDINALITY, precision=hp)
    y = jnp.maximum(_bn_nchw(y, *params["bn1"]), 0.0)
    y = lax.conv_general_dilated(y, params["w2"], (stride, stride),
                                 ((1, 1), (1, 1)), dimension_numbers=dn,
                                 feature_group_count=CARDINALITY, precision=hp)
    y = jnp.maximum(_bn_nchw(y, *params["bn2"]), 0.0)
    y = lax.conv_general_dilated(y, params["w3"], (1, 1), "VALID",
                                 dimension_numbers=dn, precision=hp)
    y = _bn_nchw(y, *params["bn3"])
    sc = lax.conv_general_dilated(x, params["ws"], (stride, stride), "VALID",
                                  dimension_numbers=dn, precision=hp)
    sc = _bn_nchw(sc, *params["bns"])
    return jnp.maximum(y + sc, 0.0)


# ----------------------------------- main ----------------------------------- #
if __name__ == "__main__":
    # ResNextBottleNeckC(in_channels=32, out_channels=16, stride=2)
    in_channels, out_channels, stride = 32, 16, 2
    n, h, w = 2, 16, 16
    c = CARDINALITY
    d = int(DEPTH * out_channels / BASEWIDTH)      # = 1
    cd = c * d                                     # = 32
    out4 = out_channels * 4                        # = 64

    key = jax.random.PRNGKey(0)
    ks = jax.random.split(key, 21)

    def conv_w(k_, shape):
        fan_in = int(np.prod(shape[1:]))
        return jax.random.normal(k_, shape, jnp.float32) / np.sqrt(fan_in)

    def bn_p(k4, ch):
        return (1.0 + 0.1 * jax.random.normal(k4[0], (ch,), jnp.float32),   # gamma
                0.1 * jax.random.normal(k4[1], (ch,), jnp.float32),         # beta
                0.1 * jax.random.normal(k4[2], (ch,), jnp.float32),         # running_mean
                jax.random.uniform(k4[3], (ch,), jnp.float32, minval=0.5,   # running_var
                                   maxval=1.5))

    params = {
        "w1": conv_w(ks[0], (cd, in_channels // c, 1, 1)),
        "w2": conv_w(ks[1], (cd, cd // c, 3, 3)),
        "w3": conv_w(ks[2], (out4, cd, 1, 1)),
        "ws": conv_w(ks[3], (out4, in_channels, 1, 1)),
        "bn1": bn_p(ks[4:8], cd),
        "bn2": bn_p(ks[8:12], cd),
        "bn3": bn_p(ks[12:16], out4),
        "bns": bn_p(ks[16:20], out4),
    }
    x = jax.random.normal(ks[20], (n, in_channels, h, w), jnp.float32)

    out = jax.block_until_ready(resnext_bottleneck_forward(x, params, stride))
    ref = jax.block_until_ready(reference_forward(x, params, stride))

    ho, wo = (h - 1) // stride + 1, (w - 1) // stride + 1
    assert out.shape == (n, out4, ho, wo)
    np.testing.assert_allclose(np.asarray(out), np.asarray(ref), rtol=5e-3, atol=5e-3)

    print("KERNEL_OK")
</pallas_src>

<mosaic_0001>
module attributes {stable_mosaic.version = 11 : i64} {
  func.func @_fused_bottleneck_kernel(%arg0: i32, %arg1: memref<1x4x9x9x32xf32, #tpu.memory_space<vmem>>, %arg2: memref<9x8x8x1xf32, #tpu.memory_space<vmem>>, %arg3: memref<1x1x32xf32, #tpu.memory_space<vmem>>, %arg4: memref<1x1x32xf32, #tpu.memory_space<vmem>>, %arg5: memref<9x1x1x32xf32, #tpu.memory_space<vmem>>, %arg6: memref<1x1x32xf32, #tpu.memory_space<vmem>>, %arg7: memref<64x64xf32, #tpu.memory_space<vmem>>, %arg8: memref<1x64xf32, #tpu.memory_space<vmem>>, %arg9: memref<1x32x128xf32, #tpu.memory_space<vmem>>) attributes {dimension_semantics = [#tpu.dimension_semantics<parallel>], iteration_bounds = array<i64: 2>, scalar_prefetch = 0 : i64, scratch_operands = 0 : i64, tpu.core_type = #tpu.core_type<tc>, window_params = [{transform_indices = @transform_0, window_bounds = array<i64: 1, 4, 9, 9, 32>}, {pipeline_mode = #tpu.pipeline_mode<synchronous>, transform_indices = @transform_1, window_bounds = array<i64: 9, 8, 8, 1>}, {pipeline_mode = #tpu.pipeline_mode<synchronous>, transform_indices = @transform_2, window_bounds = array<i64: 1, 1, 32>}, {pipeline_mode = #tpu.pipeline_mode<synchronous>, transform_indices = @transform_3, window_bounds = array<i64: 1, 1, 32>}, {pipeline_mode = #tpu.pipeline_mode<synchronous>, transform_indices = @transform_4, window_bounds = array<i64: 9, 1, 1, 32>}, {pipeline_mode = #tpu.pipeline_mode<synchronous>, transform_indices = @transform_5, window_bounds = array<i64: 1, 1, 32>}, {pipeline_mode = #tpu.pipeline_mode<synchronous>, transform_indices = @transform_6, window_bounds = array<i64: 64, 64>}, {pipeline_mode = #tpu.pipeline_mode<synchronous>, transform_indices = @transform_7, window_bounds = array<i64: 1, 64>}, {transform_indices = @transform_8, window_bounds = array<i64: 1, 32, 128>}]} {
    %c0 = arith.constant 0 : index
    %c0_0 = arith.constant 0 : index
    %c0_1 = arith.constant 0 : index
    %0 = vector.load %arg3[%c0, %c0_0, %c0_1] : memref<1x1x32xf32, #tpu.memory_space<vmem>>, vector<1x1x32xf32>
    %c0_2 = arith.constant 0 : index
    %c0_3 = arith.constant 0 : index
    %c0_4 = arith.constant 0 : index
    %1 = vector.load %arg4[%c0_2, %c0_3, %c0_4] : memref<1x1x32xf32, #tpu.memory_space<vmem>>, vector<1x1x32xf32>
    %cst = arith.constant 0.000000e+00 : f32
    %2 = vector.broadcast %cst : f32 to vector<8x8x32xf32>
    %c0_5 = arith.constant 0 : index
    %c0_6 = arith.constant 0 : index
    %c0_7 = arith.constant 0 : index
    %c0_8 = arith.constant 0 : index
    %c0_9 = arith.constant 0 : index
    %3 = vector.load %arg1[%c0_5, %c0_6, %c0_7, %c0_8, %c0_9] : memref<1x4x9x9x32xf32, #tpu.memory_space<vmem>>, vector<1x1x8x8x32xf32>
    %4 = vector.shape_cast %3 : vector<1x1x8x8x32xf32> to vector<8x8x32xf32>
    %5 = vector.broadcast %0 : vector<1x1x32xf32> to vector<8x8x32xf32>
    %6 = arith.mulf %4, %5 : vector<8x8x32xf32>
    %7 = vector.broadcast %1 : vector<1x1x32xf32> to vector<8x8x32xf32>
    %8 = arith.addf %6, %7 : vector<8x8x32xf32>
    %cst_10 = arith.constant 0.000000e+00 : f32
    %9 = vector.broadcast %cst_10 : f32 to vector<8x8x32xf32>
    %10 = arith.maximumf %8, %9 : vector<8x8x32xf32>
    %c0_11 = arith.constant 0 : index
    %c0_12 = arith.constant 0 : index
    %c0_13 = arith.constant 0 : index
    %c0_14 = arith.constant 0 : index
    %11 = vector.load %arg2[%c0_11, %c0_12, %c0_13, %c0_14] : memref<9x8x8x1xf32, #tpu.memory_space<vmem>>, vector<1x8x8x1xf32>
    %12 = vector.shape_cast %11 : vector<1x8x8x1xf32> to vector<8x8x1xf32>
    %13 = vector.broadcast %12 : vector<8x8x1xf32> to vector<8x8x32xf32>
    %14 = arith.mulf %10, %13 : vector<8x8x32xf32>
    %c0_15 = arith.constant 0 : index
    %c0_16 = arith.constant 0 : index
    %c0_17 = arith.constant 0 : index
    %c0_18 = arith.constant 0 : index
    %15 = vector.load %arg5[%c0_15, %c0_16, %c0_17, %c0_18] : memref<9x1x1x32xf32, #tpu.memory_space<vmem>>, vector<1x1x1x32xf32>
    %16 = vector.shape_cast %15 : vector<1x1x1x32xf32> to vector<1x1x32xf32>
    %17 = vector.broadcast %16 : vector<1x1x32xf32> to vector<8x8x32xf32>
    %18 = arith.mulf %14, %17 : vector<8x8x32xf32>
    %19 = arith.addf %2, %18 : vector<8x8x32xf32>
    %c0_19 = arith.constant 0 : index
    %c1 = arith.constant 1 : index
    %c0_20 = arith.constant 0 : index
    %c0_21 = arith.constant 0 : index
    %c0_22 = arith.constant 0 : index
    %20 = vector.load %arg1[%c0_19, %c1, %c0_20, %c0_21, %c0_22] : memref<1x4x9x9x32xf32, #tpu.memory_space<vmem>>, vector<1x1x8x8x32xf32>
    %21 = vector.shape_cast %20 : vector<1x1x8x8x32xf32> to vector<8x8x32xf32>
    %22 = vector.broadcast %0 : vector<1x1x32xf32> to vector<8x8x32xf32>
    %23 = arith.mulf %21, %22 : vector<8x8x32xf32>
    %24 = vector.broadcast %1 : vector<1x1x32xf32> to vector<8x8x32xf32>
    %25 = arith.addf %23, %24 : vector<8x8x32xf32>
    %cst_23 = arith.constant 0.000000e+00 : f32
    %26 = vector.broadcast %cst_23 : f32 to vector<8x8x32xf32>
    %27 = arith.maximumf %25, %26 : vector<8x8x32xf32>
    %c1_24 = arith.constant 1 : index
    %c0_25 = arith.constant 0 : index
    %c0_26 = arith.constant 0 : index
    %c0_27 = arith.constant 0 : index
    %28 = vector.load %arg2[%c1_24, %c0_25, %c0_26, %c0_27] : memref<9x8x8x1xf32, #tpu.memory_space<vmem>>, vector<1x8x8x1xf32>
    %29 = vector.shape_cast %28 : vector<1x8x8x1xf32> to vector<8x8x1xf32>
    %30 = vector.broadcast %29 : vector<8x8x1xf32> to vector<8x8x32xf32>
    %31 = arith.mulf %27, %30 : vector<8x8x32xf32>
    %c1_28 = arith.constant 1 : index
    %c0_29 = arith.constant 0 : index
    %c0_30 = arith.constant 0 : index
    %c0_31 = arith.constant 0 : index
    %32 = vector.load %arg5[%c1_28, %c0_29, %c0_30, %c0_31] : memref<9x1x1x32xf32, #tpu.memory_space<vmem>>, vector<1x1x1x32xf32>
    %33 = vector.shape_cast %32 : vector<1x1x1x32xf32> to vector<1x1x32xf32>
    %34 = vector.broadcast %33 : vector<1x1x32xf32> to vector<8x8x32xf32>
    %35 = arith.mulf %31, %34 : vector<8x8x32xf32>
    %36 = arith.addf %19, %35 : vector<8x8x32xf32>
    %c0_32 = arith.constant 0 : index
    %c0_33 = arith.constant 0 : index
    %c0_34 = arith.constant 0 : index
    %c1_35 = arith.constant 1 : index
    %c0_36 = arith.constant 0 : index
    %37 = vector.load %arg1[%c0_32, %c0_33, %c0_34, %c1_35, %c0_36] : memref<1x4x9x9x32xf32, #tpu.memory_space<vmem>>, vector<1x1x8x8x32xf32>
    %38 = vector.shape_cast %37 : vector<1x1x8x8x32xf32> to vector<8x8x32xf32>
    %39 = vector.broadcast %0 : vector<1x1x32xf32> to vector<8x8x32xf32>
    %40 = arith.mulf %38, %39 : vector<8x8x32xf32>
    %41 = vector.broadcast %1 : vector<1x1x32xf32> to vector<8x8x32xf32>
    %42 = arith.addf %40, %41 : vector<8x8x32xf32>
    %cst_37 = arith.constant 0.000000e+00 : f32
    %43 = vector.broadcast %cst_37 : f32 to vector<8x8x32xf32>
    %44 = arith.maximumf %42, %43 : vector<8x8x32xf32>
    %c2 = arith.constant 2 : index
    %c0_38 = arith.constant 0 : index
    %c0_39 = arith.constant 0 : index
    %c0_40 = arith.constant 0 : index
    %45 = vector.load %arg2[%c2, %c0_38, %c0_39, %c0_40] : memref<9x8x8x1xf32, #tpu.memory_space<vmem>>, vector<1x8x8x1xf32>
    %46 = vector.shape_cast %45 : vector<1x8x8x1xf32> to vector<8x8x1xf32>
    %47 = vector.broadcast %46 : vector<8x8x1xf32> to vector<8x8x32xf32>
    %48 = arith.mulf %44, %47 : vector<8x8x32xf32>
    %c2_41 = arith.constant 2 : index
    %c0_42 = arith.constant 0 : index
    %c0_43 = arith.constant 0 : index
    %c0_44 = arith.constant 0 : index
    %49 = vector.load %arg5[%c2_41, %c0_42, %c0_43, %c0_44] : memref<9x1x1x32xf32, #tpu.memory_space<vmem>>, vector<1x1x1x32xf32>
    %50 = vector.shape_cast %49 : vector<1x1x1x32xf32> to vector<1x1x32xf32>
    %51 = vector.broadcast %50 : vector<1x1x32xf32> to vector<8x8x32xf32>
    %52 = arith.mulf %48, %51 : vector<8x8x32xf32>
    %53 = arith.addf %36, %52 : vector<8x8x32xf32>
    %c0_45 = arith.constant 0 : index
    %c2_46 = arith.constant 2 : index
    %c0_47 = arith.constant 0 : index
    %c0_48 = arith.constant 0 : index
    %c0_49 = arith.constant 0 : index
    %54 = vector.load %arg1[%c0_45, %c2_46, %c0_47, %c0_48, %c0_49] : memref<1x4x9x9x32xf32, #tpu.memory_space<vmem>>, vector<1x1x8x8x32xf32>
    %55 = vector.shape_cast %54 : vector<1x1x8x8x32xf32> to vector<8x8x32xf32>
    %56 = vector.broadcast %0 : vector<1x1x32xf32> to vector<8x8x32xf32>
    %57 = arith.mulf %55, %56 : vector<8x8x32xf32>
    %58 = vector.broadcast %1 : vector<1x1x32xf32> to vector<8x8x32xf32>
    %59 = arith.addf %57, %58 : vector<8x8x32xf32>
    %cst_50 = arith.constant 0.000000e+00 : f32
    %60 = vector.broadcast %cst_50 : f32 to vector<8x8x32xf32>
    %61 = arith.maximumf %59, %60 : vector<8x8x32xf32>
    %c3 = arith.constant 3 : index
    %c0_51 = arith.constant 0 : index
    %c0_52 = arith.constant 0 : index
    %c0_53 = arith.constant 0 : index
    %62 = vector.load %arg2[%c3, %c0_51, %c0_52, %c0_53] : memref<9x8x8x1xf32, #tpu.memory_space<vmem>>, vector<1x8x8x1xf32>
    %63 = vector.shape_cast %62 : vector<1x8x8x1xf32> to vector<8x8x1xf32>
    %64 = vector.broadcast %63 : vector<8x8x1xf32> to vector<8x8x32xf32>
    %65 = arith.mulf %61, %64 : vector<8x8x32xf32>
    %c3_54 = arith.constant 3 : index
    %c0_55 = arith.constant 0 : index
    %c0_56 = arith.constant 0 : index
    %c0_57 = arith.constant 0 : index
    %66 = vector.load %arg5[%c3_54, %c0_55, %c0_56, %c0_57] : memref<9x1x1x32xf32, #tpu.memory_space<vmem>>, vector<1x1x1x32xf32>
    %67 = vector.shape_cast %66 : vector<1x1x1x32xf32> to vector<1x1x32xf32>
    %68 = vector.broadcast %67 : vector<1x1x32xf32> to vector<8x8x32xf32>
    %69 = arith.mulf %65, %68 : vector<8x8x32xf32>
    %70 = arith.addf %53, %69 : vector<8x8x32xf32>
    %c0_58 = arith.constant 0 : index
    %c3_59 = arith.constant 3 : index
    %c0_60 = arith.constant 0 : index
    %c0_61 = arith.constant 0 : index
    %c0_62 = arith.constant 0 : index
    %71 = vector.load %arg1[%c0_58, %c3_59, %c0_60, %c0_61, %c0_62] : memref<1x4x9x9x32xf32, #tpu.memory_space<vmem>>, vector<1x1x8x8x32xf32>
    %72 = vector.shape_cast %71 : vector<1x1x8x8x32xf32> to vector<8x8x32xf32>
    %73 = vector.broadcast %0 : vector<1x1x32xf32> to vector<8x8x32xf32>
    %74 = arith.mulf %72, %73 : vector<8x8x32xf32>
    %75 = vector.broadcast %1 : vector<1x1x32xf32> to vector<8x8x32xf32>
    %76 = arith.addf %74, %75 : vector<8x8x32xf32>
    %cst_63 = arith.constant 0.000000e+00 : f32
    %77 = vector.broadcast %cst_63 : f32 to vector<8x8x32xf32>
    %78 = arith.maximumf %76, %77 : vector<8x8x32xf32>
    %c4 = arith.constant 4 : index
    %c0_64 = arith.constant 0 : index
    %c0_65 = arith.constant 0 : index
    %c0_66 = arith.constant 0 : index
    %79 = vector.load %arg2[%c4, %c0_64, %c0_65, %c0_66] : memref<9x8x8x1xf32, #tpu.memory_space<vmem>>, vector<1x8x8x1xf32>
    %80 = vector.shape_cast %79 : vector<1x8x8x1xf32> to vector<8x8x1xf32>
    %81 = vector.broadcast %80 : vector<8x8x1xf32> to vector<8x8x32xf32>
    %82 = arith.mulf %78, %81 : vector<8x8x32xf32>
    %c4_67 = arith.constant 4 : index
    %c0_68 = arith.constant 0 : index
    %c0_69 = arith.constant 0 : index
    %c0_70 = arith.constant 0 : index
    %83 = vector.load %arg5[%c4_67, %c0_68, %c0_69, %c0_70] : memref<9x1x1x32xf32, #tpu.memory_space<vmem>>, vector<1x1x1x32xf32>
    %84 = vector.shape_cast %83 : vector<1x1x1x32xf32> to vector<1x1x32xf32>
    %85 = vector.broadcast %84 : vector<1x1x32xf32> to vector<8x8x32xf32>
    %86 = arith.mulf %82, %85 : vector<8x8x32xf32>
    %87 = arith.addf %70, %86 : vector<8x8x32xf32>
    %c0_71 = arith.constant 0 : index
    %c2_72 = arith.constant 2 : index
    %c0_73 = arith.constant 0 : index
    %c1_74 = arith.constant 1 : index
    %c0_75 = arith.constant 0 : index
    %88 = vector.load %arg1[%c0_71, %c2_72, %c0_73, %c1_74, %c0_75] : memref<1x4x9x9x32xf32, #tpu.memory_space<vmem>>, vector<1x1x8x8x32xf32>
    %89 = vector.shape_cast %88 : vector<1x1x8x8x32xf32> to vector<8x8x32xf32>
    %90 = vector.broadcast %0 : vector<1x1x32xf32> to vector<8x8x32xf32>
    %91 = arith.mulf %89, %90 : vector<8x8x32xf32>
    %92 = vector.broadcast %1 : vector<1x1x32xf32> to vector<8x8x32xf32>
    %93 = arith.addf %91, %92 : vector<8x8x32xf32>
    %cst_76 = arith.constant 0.000000e+00 : f32
    %94 = vector.broadcast %cst_76 : f32 to vector<8x8x32xf32>
    %95 = arith.maximumf %93, %94 : vector<8x8x32xf32>
    %c5 = arith.constant 5 : index
    %c0_77 = arith.constant 0 : index
    %c0_78 = arith.constant 0 : index
    %c0_79 = arith.constant 0 : index
    %96 = vector.load %arg2[%c5, %c0_77, %c0_78, %c0_79] : memref<9x8x8x1xf32, #tpu.memory_space<vmem>>, vector<1x8x8x1xf32>
    %97 = vector.shape_cast %96 : vector<1x8x8x1xf32> to vector<8x8x1xf32>
    %98 = vector.broadcast %97 : vector<8x8x1xf32> to vector<8x8x32xf32>
    %99 = arith.mulf %95, %98 : vector<8x8x32xf32>
    %c5_80 = arith.constant 5 : index
    %c0_81 = arith.constant 0 : index
    %c0_82 = arith.constant 0 : index
    %c0_83 = arith.constant 0 : index
    %100 = vector.load %arg5[%c5_80, %c0_81, %c0_82, %c0_83] : memref<9x1x1x32xf32, #tpu.memory_space<vmem>>, vector<1x1x1x32xf32>
    %101 = vector.shape_cast %100 : vector<1x1x1x32xf32> to vector<1x1x32xf32>
    %102 = vector.broadcast %101 : vector<1x1x32xf32> to vector<8x8x32xf32>
    %103 = arith.mulf %99, %102 : vector<8x8x32xf32>
    %104 = arith.addf %87, %103 : vector<8x8x32xf32>
    %c0_84 = arith.constant 0 : index
    %c0_85 = arith.constant 0 : index
    %c1_86 = arith.constant 1 : index
    %c0_87 = arith.constant 0 : index
    %c0_88 = arith.constant 0 : index
    %105 = vector.load %arg1[%c0_84, %c0_85, %c1_86, %c0_87, %c0_88] : memref<1x4x9x9x32xf32, #tpu.memory_space<vmem>>, vector<1x1x8x8x32xf32>
    %106 = vector.shape_cast %105 : vector<1x1x8x8x32xf32> to vector<8x8x32xf32>
    %107 = vector.broadcast %0 : vector<1x1x32xf32> to vector<8x8x32xf32>
    %108 = arith.mulf %106, %107 : vector<8x8x32xf32>
    %109 = vector.broadcast %1 : vector<1x1x32xf32> to vector<8x8x32xf32>
    %110 = arith.addf %108, %109 : vector<8x8x32xf32>
    %cst_89 = arith.constant 0.000000e+00 : f32
    %111 = vector.broadcast %cst_89 : f32 to vector<8x8x32xf32>
    %112 = arith.maximumf %110, %111 : vector<8x8x32xf32>
    %c6 = arith.constant 6 : index
    %c0_90 = arith.constant 0 : index
    %c0_91 = arith.constant 0 : index
    %c0_92 = arith.constant 0 : index
    %113 = vector.load %arg2[%c6, %c0_90, %c0_91, %c0_92] : memref<9x8x8x1xf32, #tpu.memory_space<vmem>>, vector<1x8x8x1xf32>
    %114 = vector.shape_cast %113 : vector<1x8x8x1xf32> to vector<8x8x1xf32>
    %115 = vector.broadcast %114 : vector<8x8x1xf32> to vector<8x8x32xf32>
    %116 = arith.mulf %112, %115 : vector<8x8x32xf32>
    %c6_93 = arith.constant 6 : index
    %c0_94 = arith.constant 0 : index
    %c0_95 = arith.constant 0 : index
    %c0_96 = arith.constant 0 : index
    %117 = vector.load %arg5[%c6_93, %c0_94, %c0_95, %c0_96] : memref<9x1x1x32xf32, #tpu.memory_space<vmem>>, vector<1x1x1x32xf32>
    %118 = vector.shape_cast %117 : vector<1x1x1x32xf32> to vector<1x1x32xf32>
    %119 = vector.broadcast %118 : vector<1x1x32xf32> to vector<8x8x32xf32>
    %120 = arith.mulf %116, %119 : vector<8x8x32xf32>
    %121 = arith.addf %104, %120 : vector<8x8x32xf32>
    %c0_97 = arith.constant 0 : index
    %c1_98 = arith.constant 1 : index
    %c1_99 = arith.constant 1 : index
    %c0_100 = arith.constant 0 : index
    %c0_101 = arith.constant 0 : index
    %122 = vector.load %arg1[%c0_97, %c1_98, %c1_99, %c0_100, %c0_101] : memref<1x4x9x9x32xf32, #tpu.memory_space<vmem>>, vector<1x1x8x8x32xf32>
    %123 = vector.shape_cast %122 : vector<1x1x8x8x32xf32> to vector<8x8x32xf32>
    %124 = vector.broadcast %0 : vector<1x1x32xf32> to vector<8x8x32xf32>
    %125 = arith.mulf %123, %124 : vector<8x8x32xf32>
    %126 = vector.broadcast %1 : vector<1x1x32xf32> to vector<8x8x32xf32>
    %127 = arith.addf %125, %126 : vector<8x8x32xf32>
    %cst_102 = arith.constant 0.000000e+00 : f32
    %128 = vector.broadcast %cst_102 : f32 to vector<8x8x32xf32>
    %129 = arith.maximumf %127, %128 : vector<8x8x32xf32>
    %c7 = arith.constant 7 : index
    %c0_103 = arith.constant 0 : index
    %c0_104 = arith.constant 0 : index
    %c0_105 = arith.constant 0 : index
    %130 = vector.load %arg2[%c7, %c0_103, %c0_104, %c0_105] : memref<9x8x8x1xf32, #tpu.memory_space<vmem>>, vector<1x8x8x1xf32>
    %131 = vector.shape_cast %130 : vector<1x8x8x1xf32> to vector<8x8x1xf32>
    %132 = vector.broadcast %131 : vector<8x8x1xf32> to vector<8x8x32xf32>
    %133 = arith.mulf %129, %132 : vector<8x8x32xf32>
    %c7_106 = arith.constant 7 : index
    %c0_107 = arith.constant 0 : index
    %c0_108 = arith.constant 0 : index
    %c0_109 = arith.constant 0 : index
    %134 = vector.load %arg5[%c7_106, %c0_107, %c0_108, %c0_109] : memref<9x1x1x32xf32, #tpu.memory_space<vmem>>, vector<1x1x1x32xf32>
    %135 = vector.shape_cast %134 : vector<1x1x1x32xf32> to vector<1x1x32xf32>
    %136 = vector.broadcast %135 : vector<1x1x32xf32> to vector<8x8x32xf32>
    %137 = arith.mulf %133, %136 : vector<8x8x32xf32>
    %138 = arith.addf %121, %137 : vector<8x8x32xf32>
    %c0_110 = arith.constant 0 : index
    %c0_111 = arith.constant 0 : index
    %c1_112 = arith.constant 1 : index
    %c1_113 = arith.constant 1 : index
    %c0_114 = arith.constant 0 : index
    %139 = vector.load %arg1[%c0_110, %c0_111, %c1_112, %c1_113, %c0_114] : memref<1x4x9x9x32xf32, #tpu.memory_space<vmem>>, vector<1x1x8x8x32xf32>
    %140 = vector.shape_cast %139 : vector<1x1x8x8x32xf32> to vector<8x8x32xf32>
    %141 = vector.broadcast %0 : vector<1x1x32xf32> to vector<8x8x32xf32>
    %142 = arith.mulf %140, %141 : vector<8x8x32xf32>
    %143 = vector.broadcast %1 : vector<1x1x32xf32> to vector<8x8x32xf32>
    %144 = arith.addf %142, %143 : vector<8x8x32xf32>
    %cst_115 = arith.constant 0.000000e+00 : f32
    %145 = vector.broadcast %cst_115 : f32 to vector<8x8x32xf32>
    %146 = arith.maximumf %144, %145 : vector<8x8x32xf32>
    %c8 = arith.constant 8 : index
    %c0_116 = arith.constant 0 : index
    %c0_117 = arith.constant 0 : index
    %c0_118 = arith.constant 0 : index
    %147 = vector.load %arg2[%c8, %c0_116, %c0_117, %c0_118] : memref<9x8x8x1xf32, #tpu.memory_space<vmem>>, vector<1x8x8x1xf32>
    %148 = vector.shape_cast %147 : vector<1x8x8x1xf32> to vector<8x8x1xf32>
    %149 = vector.broadcast %148 : vector<8x8x1xf32> to vector<8x8x32xf32>
    %150 = arith.mulf %146, %149 : vector<8x8x32xf32>
    %c8_119 = arith.constant 8 : index
    %c0_120 = arith.constant 0 : index
    %c0_121 = arith.constant 0 : index
    %c0_122 = arith.constant 0 : index
    %151 = vector.load %arg5[%c8_119, %c0_120, %c0_121, %c0_122] : memref<9x1x1x32xf32, #tpu.memory_space<vmem>>, vector<1x1x1x32xf32>
    %152 = vector.shape_cast %151 : vector<1x1x1x32xf32> to vector<1x1x32xf32>
    %153 = vector.broadcast %152 : vector<1x1x32xf32> to vector<8x8x32xf32>
    %154 = arith.mulf %150, %153 : vector<8x8x32xf32>
    %155 = arith.addf %138, %154 : vector<8x8x32xf32>
    %c0_123 = arith.constant 0 : index
    %c0_124 = arith.constant 0 : index
    %c0_125 = arith.constant 0 : index
    %156 = vector.load %arg6[%c0_123, %c0_124, %c0_125] : memref<1x1x32xf32, #tpu.memory_space<vmem>>, vector<1x1x32xf32>
    %157 = vector.broadcast %156 : vector<1x1x32xf32> to vector<8x8x32xf32>
    %158 = arith.addf %155, %157 : vector<8x8x32xf32>
    %cst_126 = arith.constant 0.000000e+00 : f32
    %159 = vector.broadcast %cst_126 : f32 to vector<8x8x32xf32>
    %160 = arith.maximumf %158, %159 : vector<8x8x32xf32>
    %c0_127 = arith.constant 0 : index
    %c3_128 = arith.constant 3 : index
    %c0_129 = arith.constant 0 : index
    %c0_130 = arith.constant 0 : index
    %c0_131 = arith.constant 0 : index
    %161 = vector.load %arg1[%c0_127, %c3_128, %c0_129, %c0_130, %c0_131] : memref<1x4x9x9x32xf32, #tpu.memory_space<vmem>>, vector<1x1x8x8x32xf32>
    %162 = vector.shape_cast %161 : vector<1x1x8x8x32xf32> to vector<8x8x32xf32>
    %163 = vector.shape_cast %160 : vector<8x8x32xf32> to vector<64x32xf32>
    %164 = vector.shape_cast %162 : vector<8x8x32xf32> to vector<64x32xf32>
    %165 = tpu.concatenate %163, %164 in 1 : vector<64x32xf32>, vector<64x32xf32> -> vector<64x64xf32>
    %c0_132 = arith.constant 0 : index
    %c0_133 = arith.constant 0 : index
    %166 = vector.load %arg7[%c0_132, %c0_133] : memref<64x64xf32, #tpu.memory_space<vmem>>, vector<64x64xf32>
    %cst_134 = arith.constant dense<0.000000e+00> : vector<64x64xf32>
    %167 = tpu.matmul %165, %166, %cst_134 {dimension_numbers = #tpu.dot_dimension_numbers<[1], [0], [0], [1], [0, 0, 1, 1], [], []>} : vector<64x64xf32>, vector<64x64xf32>, vector<64x64xf32> -> vector<64x64xf32>
    %c0_135 = arith.constant 0 : index
    %c0_136 = arith.constant 0 : index
    %168 = vector.load %arg8[%c0_135, %c0_136] : memref<1x64xf32, #tpu.memory_space<vmem>>, vector<1x64xf32>
    %169 = vector.broadcast %168 : vector<1x64xf32> to vector<64x64xf32>
    %170 = arith.addf %167, %169 : vector<64x64xf32>
    %cst_137 = arith.constant 0.000000e+00 : f32
    %171 = vector.broadcast %cst_137 : f32 to vector<64x64xf32>
    %172 = arith.maximumf %170, %171 : vector<64x64xf32>
    %173 = vector.extract_strided_slice %172 {offsets = [0, 0], sizes = [32, 64], strides = [1, 1]} : vector<64x64xf32> to vector<32x64xf32>
    %174 = vector.extract_strided_slice %172 {offsets = [32, 0], sizes = [32, 64], strides = [1, 1]} : vector<64x64xf32> to vector<32x64xf32>
    %175 = tpu.concatenate %173, %174 in 1 : vector<32x64xf32>, vector<32x64xf32> -> vector<32x128xf32>
    %c0_138 = arith.constant 0 : index
    %c0_139 = arith.constant 0 : index
    %c0_140 = arith.constant 0 : index
    %176 = vector.load %arg9[%c0_138, %c0_139, %c0_140] : memref<1x32x128xf32, #tpu.memory_space<vmem>>, vector<1x32x128xf32>
    %177 = vector.shape_cast %176 : vector<1x32x128xf32> to vector<32x128xf32>
    %178 = vector.shape_cast %175 : vector<32x128xf32> to vector<1x32x128xf32>
    tpu.vector_store %arg9[%c0_138, %c0_139, %c0_140], %178 {strides = array<i32>} : memref<1x32x128xf32, #tpu.memory_space<vmem>>, vector<1x32x128xf32>,
    return
  }
  func.func @transform_0(%arg0: i32) -> (i32, i32, i32, i32, i32) {
    %c0_i32 = arith.constant 0 : i32
    %c0_i32_0 = arith.constant 0 : i32
    %c0_i32_1 = arith.constant 0 : i32
    %c0_i32_2 = arith.constant 0 : i32
    %c0_i32_3 = arith.constant 0 : i32
    return %arg0, %c0_i32, %c0_i32_0, %c0_i32_1, %c0_i32_2 : i32, i32, i32, i32, i32
  }
  func.func @transform_1(%arg0: i32) -> (i32, i32, i32, i32) {
    %c0_i32 = arith.constant 0 : i32
    %c0_i32_0 = arith.constant 0 : i32
    %c0_i32_1 = arith.constant 0 : i32
    %c0_i32_2 = arith.constant 0 : i32
    %c0_i32_3 = arith.constant 0 : i32
    return %c0_i32, %c0_i32_0, %c0_i32_1, %c0_i32_2 : i32, i32, i32, i32
  }
  func.func @transform_2(%arg0: i32) -> (i32, i32, i32) {
    %c0_i32 = arith.constant 0 : i32
    %c0_i32_0 = arith.constant 0 : i32
    %c0_i32_1 = arith.constant 0 : i32
    %c0_i32_2 = arith.constant 0 : i32
    return %c0_i32, %c0_i32_0, %c0_i32_1 : i32, i32, i32
  }
  func.func @transform_3(%arg0: i32) -> (i32, i32, i32) {
    %c0_i32 = arith.constant 0 : i32
    %c0_i32_0 = arith.constant 0 : i32
    %c0_i32_1 = arith.constant 0 : i32
    %c0_i32_2 = arith.constant 0 : i32
    return %c0_i32, %c0_i32_0, %c0_i32_1 : i32, i32, i32
  }
  func.func @transform_4(%arg0: i32) -> (i32, i32, i32, i32) {
    %c0_i32 = arith.constant 0 : i32
    %c0_i32_0 = arith.constant 0 : i32
    %c0_i32_1 = arith.constant 0 : i32
    %c0_i32_2 = arith.constant 0 : i32
    %c0_i32_3 = arith.constant 0 : i32
    return %c0_i32, %c0_i32_0, %c0_i32_1, %c0_i32_2 : i32, i32, i32, i32
  }
  func.func @transform_5(%arg0: i32) -> (i32, i32, i32) {
    %c0_i32 = arith.constant 0 : i32
    %c0_i32_0 = arith.constant 0 : i32
    %c0_i32_1 = arith.constant 0 : i32
    %c0_i32_2 = arith.constant 0 : i32
    return %c0_i32, %c0_i32_0, %c0_i32_1 : i32, i32, i32
  }
  func.func @transform_6(%arg0: i32) -> (i32, i32) {
    %c0_i32 = arith.constant 0 : i32
    %c0_i32_0 = arith.constant 0 : i32
    %c0_i32_1 = arith.constant 0 : i32
    return %c0_i32, %c0_i32_0 : i32, i32
  }
  func.func @transform_7(%arg0: i32) -> (i32, i32) {
    %c0_i32 = arith.constant 0 : i32
    %c0_i32_0 = arith.constant 0 : i32
    %c0_i32_1 = arith.constant 0 : i32
    return %c0_i32, %c0_i32_0 : i32, i32
  }
  func.func @transform_8(%arg0: i32) -> (i32, i32, i32) {
    %c0_i32 = arith.constant 0 : i32
    %c0_i32_0 = arith.constant 0 : i32
    %c0_i32_1 = arith.constant 0 : i32
    return %arg0, %c0_i32, %c0_i32_0 : i32, i32, i32
  }
}

</mosaic_0001>

<bundles_post_ra>
// kernel: tpu_custom_call.1
= control target key start
LH: loop header
LB: loop body
LE: loop exit
PB: predicated region body
PF: predicated region fallthrough
CT: control target
= control target key end

     0   :  { %13 = vsyncpa [#allocation3], 0  ;;  %s2816_s0 = inlined_call_operand.vmem [shape: f32[2,4,9,9,32], index: 0, kind: input, shape index: {}]   ;;  %s2817_s1 = inlined_call_operand.vmem [shape: f32[9,8,8,1], index: 1, kind: input, shape index: {}]   ;;  %s2818_s2 = inlined_call_operand.vmem [shape: f32[1,1,32], index: 2, kind: input, shape index: {}]   ;;  %s2819_s3 = inlined_call_operand.vmem [shape: f32[1,1,32], index: 3, kind: input, shape index: {}]   ;;  %s2820_s4 = inlined_call_operand.vmem [shape: f32[9,1,1,32], index: 4, kind: input, shape index: {}]   ;;  %s2821_s5 = inlined_call_operand.vmem [shape: f32[1,1,32], index: 5, kind: input, shape index: {}]   ;;  %s2822_s6 = inlined_call_operand.vmem [shape: f32[64,64], index: 6, kind: input, shape index: {}]   ;;  %s2823_s7 = inlined_call_operand.vmem [shape: f32[1,64], index: 7, kind: input, shape index: {}]   ;;  %s2824_s8 = inlined_call_operand.hbm [shape: f32[2,32,128], index: 8, kind: output, shape index: {}]  }
   0x1   :  { %15 = vsyncpa [#allocation3 + $0x1], 0  ;;  %s1904_s27 = smov 0   ;;  %s1906_s28 = smov 0  }
   0x2   :  { %s1908_s29 = smov 0   ;;  %s1910_s30 = smov 0  }
   0x3 LB: > { %s1925_s9 = sadd.s32 4294967295, %s1852_s30   ;;  %s1554_s10 = sadd.s32 4294967294, %s1852_s30   ;;  %s1852_s30 = sphi %s1910_s30, %s2830_s30   ;;  %s1848_s29 = sphi %s1908_s29, %s2829_s29   ;;  %s1844_s28 = sphi %s1906_s28, %s2828_s28   ;;  %s1840_s27 = sphi %s1904_s27, %s2827_s27  }
   0x4   : > { %s1929_s11 = sadd.s32 1, %s1852_s30   ;;  %s201_s12 = sadd.s32 1, %s1848_s29 }
   0x5   : > { %s198_s13 = ssub.s32 %s1852_s30, %s1929_s11  ;;  %p211_p0 = scmp.ne.s32.totalorder %s1848_s29, %s1844_s28 }
   0x6   : > { %p199_p1 = scmp.eq.s32.totalorder %s198_s13, 0  ;;  %p212_p2 = scmp.eq.s32.totalorder %s1925_s9, 1 }
   0x7   : > { %p217_p3 = scmp.ne.s32.totalorder %s1844_s28, %s1840_s27  ;;  %p218_p4 = scmp.eq.s32.totalorder %s1554_s10, 1 }
   0x8   : > { %s1940_s14 = scalar_select %p199_p1, %s1848_s29, %s201_s12  }
   0x9   : > { %p1942_p5 = por %p212_p2, %p211_p0  ;;  %p1946_p6 = por %p218_p4, %p217_p3 }
   0xa   : > { %p1557_p7 = scmp.ge.s32.totalorder %s1852_s30, 1  ;;  %p265_p8 = scmp.lt.s32.totalorder %s1852_s30, 3 }
   0xc   : > { %p266_p9 = pnand %p1557_p7, %p265_p8 }
   0xd   : > { %p299_p10 = scmp.lt.s32.totalorder (!%p266_p9), %s1925_s9, 1  ;;  %s1856_s17 = smov (!%p266_p9), 64  }
   0xe   : > { %269 = sbr.rel (%p266_p9) target bundleno = 548 (0x224), region = 52  ;;  %s296_s19 = sand.u32 (!%p266_p9), 1, %s1844_s28  }
   0xf   : > { %s1558_s20 = sshll.u32 (!%p266_p9), %s296_s19, 5 }
  0x10   : > { %s298_s22 = scalar_lea.vmem (!%p266_p9), [#allocation2], %s1558_s20  ;;  %s1810_s20 = scalar_lea.hbm (!%p266_p9), %s2824_s8, 64 }
  0x11   : > { %s1489_s25 = sshll.u32 (!%p266_p9), %s298_s22, 4  ;;  %s1490_s25 = int_to_ptr.vmem [resolvable:$true] %s1489_s25 }
  0x13   : > { %v348_v0 = vld [vmem:[%s2817_s1 + $0x20] sm:$0xff]  ;;  %v346_v1 = vld [vmem:[%s2817_s1 + $0x10] sm:$0xff]  ;;  %v1854_v3 = vmov 0   ;;  %v349_v4 = vld [vmem:[%s2817_s1 + $0x28] sm:$0xff]  ;;  %s300_s18 = scalar_select %p299_p10, %s1925_s9, 1  ;;  %vm1357_vm0 = vcmask 261120  }
  0x14   : > { %v344_v2 = vld [vmem:[%s2817_s1] sm:$0xff]  ;;  %1773 = vset.pattern.permute.xlu2 %v1854_v3  ;;  %1772 = vset.pattern.permute.xlu1 %v1854_v3  ;;  %v347_v5 = vld [vmem:[%s2817_s1 + $0x18] sm:$0xff]  ;;  %v345_v6 = vld [vmem:[%s2817_s1 + $0x8] sm:$0xff]  ;;  %vm1378_vm1 = vcmask 523264  }
  0x15   : > { %1771 = vset.pattern.permute.xlu0 %v1854_v3  ;;  %374 = vperm.xlu2 %1773, %v348_v0   ;;  %v1568_v7 = vld [vmem:[%s2817_s1 + $0x40] sm:$0xff]  ;;  %v351_v8 = vld [vmem:[%s2817_s1 + $0x38] sm:$0xff]  ;;  %v350_v9 = vld [vmem:[%s2817_s1 + $0x30] sm:$0xff]  ;;  %s1726_s21 = smul.u32 576, %s300_s18  ;;  %s1855_s18 = smov 32  }
  0x16   : > { %364 = vperm.xlu1 %1772, %v346_v1   ;;  %354 = vperm.xlu0 %1771, %v344_v2   ;;  %v1571_v10 = vld [vmem:[%s2817_s1 + $0x58] sm:$0xff]  ;;  %v1570_v11 = vld [vmem:[%s2817_s1 + $0x50] sm:$0xff]  ;;  %v1569_v12 = vld [vmem:[%s2817_s1 + $0x48] sm:$0xff] }
  0x17   : > { %v1574_v13 = vld [vmem:[%s2817_s1 + $0x70] sm:$0xff]  ;;  %v1573_v14 = vld [vmem:[%s2817_s1 + $0x68] sm:$0xff]  ;;  %v1572_v15 = vld [vmem:[%s2817_s1 + $0x60] sm:$0xff]  ;;  %s2065_s12 = scalar_lea.vmem %s2816_s0, %s1726_s21  ;;  %s1701_s21 = sshll.u32 %s1925_s9, 5 }
  0x18   : > { %v1578_v16 = vld [vmem:[%s2817_s1 + $0x88] sm:$0xff]  ;;  %v1577_v17 = vld [vmem:[%s2817_s1 + $0x80] sm:$0xff]  ;;  %v1575_v18 = vld [vmem:[%s2817_s1 + $0x78] sm:$0xff]  ;;  %s1477_s9 = scalar_lea.sflag [#allocation3], %s296_s19 }
  0x19   : > { %v1581_v19 = vld [vmem:[%s2817_s1 + $0xa0] sm:$0xff]  ;;  %v1580_v20 = vld [vmem:[%s2817_s1 + $0x98] sm:$0xff]  ;;  %v1579_v21 = vld [vmem:[%s2817_s1 + $0x90] sm:$0xff] }
  0x1a   : > { %v1584_v22 = vld [vmem:[%s2817_s1 + $0xb8] sm:$0xff]  ;;  %v1583_v23 = vld [vmem:[%s2817_s1 + $0xb0] sm:$0xff]  ;;  %v1582_v24 = vld [vmem:[%s2817_s1 + $0xa8] sm:$0xff] }
  0x1b   : > { %v1596_v25 = vld [vmem:[%s2817_s1 + $0xd0] sm:$0xff]  ;;  %v1595_v26 = vld [vmem:[%s2817_s1 + $0xc8] sm:$0xff]  ;;  %v1594_v27 = vld [vmem:[%s2817_s1 + $0xc0] sm:$0xff] }
  0x1c   : > { %v1599_v28 = vld [vmem:[%s2817_s1 + $0xe8] sm:$0xff]  ;;  %v1598_v29 = vld [vmem:[%s2817_s1 + $0xe0] sm:$0xff]  ;;  %v1597_v30 = vld [vmem:[%s2817_s1 + $0xd8] sm:$0xff] }
  0x1d   : > { %379 = vperm.xlu2 %1773, %v349_v4   ;;  %v1611_v31 = vld [vmem:[%s2817_s1 + $0x100] sm:$0xff]  ;;  %v1601_v32 = vld [vmem:[%s2817_s1 + $0xf8] sm:$0xff]  ;;  %v1600_v33 = vld [vmem:[%s2817_s1 + $0xf0] sm:$0xff] }
  0x1e   : > { %369 = vperm.xlu1 %1772, %v347_v5   ;;  %359 = vperm.xlu0 %1771, %v345_v6   ;;  %v1614_v34 = vld [vmem:[%s2817_s1 + $0x118] sm:$0xff]  ;;  %v1613_v35 = vld [vmem:[%s2817_s1 + $0x110] sm:$0xff]  ;;  %v1612_v36 = vld [vmem:[%s2817_s1 + $0x108] sm:$0xff] }
  0x1f   : > { %v2072_v38 = vld [vmem:[%s2818_s2] ss:$0 sm:$0xff]  ;;  %v1560_v39 = vld [vmem:[%s2065_s12 + $0x90] sm:$0xff]  ;;  %v1616_v41 = vld [vmem:[%s2817_s1 + $0x128] sm:$0xff] }
  0x20   : > { %v1617_v40 = vld [vmem:[%s2817_s1 + $0x130] sm:$0xff]  ;;  %v1615_v42 = vld [vmem:[%s2817_s1 + $0x120] sm:$0xff]  ;;  %v429_v44 = vmul.f32 %v2072_v38, %v1560_v39  ;;  %v1650_v39 = vld [vmem:[%s2817_s1 + $0x1a8] sm:$0xff] }
  0x21   : > { %v2087_v43 = vld [vmem:[%s2819_s3] ss:$0 sm:$0xff]  ;;  %v1634_v50 = vld [vmem:[%s2817_s1 + $0x170] sm:$0xff]  ;;  %v2109_v55 = vld [vmem:[%s2820_s4 + $0x1] ss:$0 sm:$0xff] }
  0x22   : > { %v437_v46 = vadd.f32 %v2087_v43, %v429_v44  ;;  %v1563_v47 = vld [vmem:[%s2065_s12 + $0xc0] sm:$0xff]  ;;  %v1668_v61 = vld [vmem:[%s2817_s1 + $0x1f0] sm:$0xff] }
  0x23   : > { %v1649_v48 = vld [vmem:[%s2817_s1 + $0x1a0] sm:$0xff]  ;;  %v432_v53 = vmul.f32 %v2072_v38, %v1563_v47  ;;  %v309_v62 = vld [vmem:[%s2065_s12 + $0x30] sm:$0xff] }
  0x24   : > { %v306_v49 = vld [vmem:[%s2065_s12] sm:$0xff]  ;;  %v445_v52 = vmax.f32 %v437_v46, 0.0  ;;  %v307_v63 = vld [vmem:[%s2065_s12 + $0x10] sm:$0xff]  ;;  %v320_v4 = vmul.f32 %v2072_v38, %v309_v62 }
  0x25   : > { %464 = vperm.xlu2 %1773, %v1568_v7   ;;  %v1632_v51 = vld [vmem:[%s2817_s1 + $0x160] sm:$0xff]  ;;  %v317_v54 = vmul.f32 %v2072_v38, %v306_v49  ;;  %v440_v58 = vadd.f32 %v2087_v43, %v432_v53  ;;  %v1651_v1 = vld [vmem:[%s2817_s1 + $0x1b0] sm:$0xff]  ;;  %v318_v5 = vmul.f32 %v2072_v38, %v307_v63  ;;  %v1633_v49 = vld [vmem:[%s2817_s1 + $0x168] sm:$0xff] }
  0x26   : > { %389 = vperm.xlu1 %1772, %v351_v8   ;;  %384 = vperm.xlu0 %1771, %v350_v9   ;;  %v1666_v0 = vld [vmem:[%s2817_s1 + $0x1e0] sm:$0xff] }
  0x27   : > { %v328_v59 = vadd.f32 %v2087_v43, %v317_v54  ;;  %v448_v2 = vmax.f32 %v440_v58, 0.0  ;;  %v2130_v6 = vld [vmem:[%s2820_s4] ss:$0 sm:$0xff]  ;;  %v311_v58 = vld [vmem:[%s2065_s12 + $0x50] sm:$0xff] }
  0x29   : > { %v336_v3 = vmax.f32 %v328_v59, 0.0 }
  0x2d   : > { %479 = vperm.xlu2 %1773, %v1571_v10  }
  0x2e   : > { %474 = vperm.xlu1 %1772, %v1570_v11   ;;  %469 = vperm.xlu0 %1771, %v1569_v12   ;;  %v1566_v11 = vld [vmem:[%s2065_s12 + $0xf0] sm:$0xff] }
  0x35   : > { %494 = vperm.xlu2 %1773, %v1574_v13   ;;  %v331_v13 = vadd.f32 %v2087_v43, %v320_v4 }
  0x36   : > { %489 = vperm.xlu1 %1772, %v1573_v14   ;;  %484 = vperm.xlu0 %1771, %v1572_v15   ;;  %v329_v14 = vadd.f32 %v2087_v43, %v318_v5  ;;  %v532_v15 = vld [vmem:[%s2065_s12 + $0x11] sm:$0xff]  ;;  %v1565_v5 = vld [vmem:[%s2065_s12 + $0xe0] sm:$0xff] }
  0x3d   : > { %579 = vperm.xlu2 %1773, %v1578_v16  }
  0x3e   : > { %574 = vperm.xlu1 %1772, %v1577_v17   ;;  %499 = vperm.xlu0 %1771, %v1575_v18   ;;  %v1685_v17 = vld [vmem:[%s2817_s1 + $0x230] sm:$0xff]  ;;  %v312_v18 = vld [vmem:[%s2065_s12 + $0x60] sm:$0xff] }
  0x45   : > { %594 = vperm.xlu2 %1773, %v1581_v19  }
  0x46   : > { %589 = vperm.xlu1 %1772, %v1580_v20   ;;  %584 = vperm.xlu0 %1771, %v1579_v21   ;;  %v1683_v20 = vld [vmem:[%s2817_s1 + $0x220] sm:$0xff]  ;;  %v1618_v21 = vld [vmem:[%s2817_s1 + $0x138] sm:$0xff] }
  0x4d   : > { %609 = vperm.xlu2 %1773, %v1584_v22   ;;  %v435_v22 = vmul.f32 %v2072_v38, %v1566_v11  ;;  %v1669_v11 = vld [vmem:[%s2817_s1 + $0x1f8] sm:$0xff] }
  0x4e   : > { %604 = vperm.xlu1 %1772, %v1583_v23   ;;  %599 = vperm.xlu0 %1771, %v1582_v24   ;;  %v540_v23 = vmul.f32 %v2072_v38, %v532_v15 }
  0x55   : > { %695 = vperm.xlu2 %1773, %v1596_v25   ;;  %v339_v25 = vmax.f32 %v331_v13, 0.0 }
  0x56   : > { %690 = vperm.xlu1 %1772, %v1595_v26   ;;  %685 = vperm.xlu0 %1771, %v1594_v27   ;;  %v337_v26 = vmax.f32 %v329_v14, 0.0  ;;  %v323_v27 = vmul.f32 %v2072_v38, %v312_v18 }
  0x5d   : > { %710 = vperm.xlu2 %1773, %v1599_v28  }
  0x5e   : > { %705 = vperm.xlu1 %1772, %v1598_v29   ;;  %700 = vperm.xlu0 %1771, %v1597_v30   ;;  %v2156_v29 = vadd.f32 %v2087_v43, %v435_v22  ;;  %v308_v30 = vld [vmem:[%s2065_s12 + $0x20] sm:$0xff] }
  0x60   : > { %v451_v44 = vmax.f32 %v2156_v29, 0.0 }
  0x65   : > { %796 = vperm.xlu2 %1773, %v1611_v31  }
  0x66   : > { %720 = vperm.xlu1 %1772, %v1601_v32   ;;  %715 = vperm.xlu0 %1771, %v1600_v33   ;;  %v548_v33 = vadd.f32 %v2087_v43, %v540_v23 }
  0x6d   : > { %811 = vperm.xlu2 %1773, %v1614_v34  }
  0x6e   : > { %806 = vperm.xlu1 %1772, %v1613_v35   ;;  %801 = vperm.xlu0 %1771, %v1612_v36   ;;  %v2161_v36 = vadd.f32 %v2087_v43, %v323_v27 }
  0x6f   : > { %v2067_v37 = vpop.permute.xlu2 %374 }
  0x75   : > { %826 = vperm.xlu2 %1773, %v1617_v40   ;;  %v1562_v40 = vld [vmem:[%s2065_s12 + $0xb0] sm:$0xff] }
  0x76   : > { %821 = vperm.xlu1 %1772, %v1616_v41   ;;  %816 = vperm.xlu0 %1771, %v1615_v42   ;;  %v1561_v41 = vld [vmem:[%s2065_s12 + $0xa0] sm:$0xff]  ;;  %v319_v42 = vmul.f32 %v2072_v38, %v308_v30  ;;  %v431_v53 = vmul.f32 %v2072_v38, %v1562_v40 }
  0x77   : > { %v2090_v45 = vpop.permute.xlu2 %379  ;;  %v430_v54 = vmul.f32 %v2072_v38, %v1561_v41 }
  0x78   : > { %v330_v59 = vadd.f32 %v2087_v43, %v319_v42  ;;  %v531_v42 = vld [vmem:[%s2065_s12 + $0x1] sm:$0xff] }
  0x79   : > { %v2202_v4 = vadd.f32 %v2087_v43, %v430_v54 }
  0x7a   : > { %v338_v13 = vmax.f32 %v330_v59, 0.0  ;;  %v1684_v59 = vld [vmem:[%s2817_s1 + $0x228] sm:$0xff] }
  0x7b   : > { %v446_v22 = vmax.f32 %v2202_v4, 0.0 }
  0x7d   : > { %1037 = vperm.xlu2 %1773, %v1649_v48   ;;  %v1635_v48 = vld [vmem:[%s2817_s1 + $0x178] sm:$0xff] }
  0x7e   : > { %936 = vperm.xlu1 %1772, %v1634_v50   ;;  %926 = vperm.xlu0 %1771, %v1632_v51   ;;  %v556_v50 = vmax.f32 %v548_v33, 0.0 }
  0x7f   : > { %v465_v56 = vpop.permute.xlu2 %464 }
  0x80   : > { %v502_v57 = vmul.f32 %v465_v56, %v445_v52  ;;  %v342_v52 = vmax.f32 %v2161_v36, 0.0  ;;  %v2188_v56 = vld [vmem:[%s2820_s4 + $0x2] ss:$0 sm:$0xff] }
  0x82   : > { %v515_v60 = vmul.f32 %v2109_v55, %v502_v57  ;;  %v310_v57 = vld [vmem:[%s2065_s12 + $0x40] sm:$0xff] }
  0x85   : > { %1158 = vperm.xlu2 %1773, %v1668_v61  }
  0x86   : > { %1148 = vperm.xlu1 %1772, %v1666_v0   ;;  %1047 = vperm.xlu0 %1771, %v1651_v1  }
  0x87   : > { %v480_v7 = vpop.permute.xlu2 %479 }
  0x88   : > { %v505_v8 = vmul.f32 %v480_v7, %v448_v2  ;;  %v2132_v9 = vpop.permute.xlu1 %364  ;;  %v355_v10 = vpop.permute.xlu0 %354  ;;  %v535_v2 = vld [vmem:[%s2065_s12 + $0x41] sm:$0xff]  ;;  %v321_v7 = vmul.f32 %v2072_v38, %v310_v57 }
  0x89   : > { %v392_v12 = vmul.f32 %v355_v10, %v336_v3  ;;  %v439_v3 = vadd.f32 %v2087_v43, %v431_v53  ;;  %v543_v18 = vmul.f32 %v2072_v38, %v535_v2  ;;  %v394_v27 = vmul.f32 %v2132_v9, %v338_v13 }
  0x8a   : > { %v518_v16 = vmul.f32 %v2109_v55, %v505_v8  ;;  %v322_v8 = vmul.f32 %v2072_v38, %v311_v58  ;;  %v1686_v58 = vld [vmem:[%s2817_s1 + $0x238] sm:$0xff] }
  0x8b   : > { %v404_v19 = vmul.f32 %v2130_v6, %v392_v12  ;;  %v1564_v12 = vld [vmem:[%s2065_s12 + $0xd0] sm:$0xff]  ;;  %v406_v53 = vmul.f32 %v2130_v6, %v394_v27  ;;  %v2289_v27 = vld [vmem:[%s2065_s12 + $0x220] sm:$0xff] }
  0x8c   : > { %v433_v23 = vmul.f32 %v2072_v38, %v1564_v12 }
  0x8d   : > { %v2152_v24 = vadd.f32 %v515_v60, %v404_v19  ;;  %1268 = vperm.xlu2 %1773, %v1685_v17   ;;  %v1652_v17 = vld [vmem:[%s2817_s1 + $0x1b8] sm:$0xff]  ;;  %v434_v19 = vmul.f32 %v2072_v38, %v1565_v5 }
  0x8e   : > { %1258 = vperm.xlu1 %1772, %v1683_v20   ;;  %831 = vperm.xlu0 %1771, %v1618_v21   ;;  %v447_v21 = vmax.f32 %v439_v3, 0.0  ;;  %v441_v41 = vadd.f32 %v2087_v43, %v433_v23  ;;  %v533_v23 = vld [vmem:[%s2065_s12 + $0x21] sm:$0xff] }
  0x8f   : > { %v495_v28 = vpop.permute.xlu2 %494 }
  0x90   : > { %v370_v31 = vpop.permute.xlu1 %369  ;;  %v360_v32 = vpop.permute.xlu0 %359  ;;  %v508_v60 = vmul.f32 %v495_v28, %v451_v44  ;;  %v313_v28 = vld [vmem:[%s2065_s12 + $0x70] sm:$0xff]  ;;  %v449_v3 = vmax.f32 %v441_v41, 0.0 }
  0x91   : > { %v395_v34 = vmul.f32 %v370_v31, %v339_v25  ;;  %v393_v35 = vmul.f32 %v360_v32, %v337_v26  ;;  %v332_v25 = vadd.f32 %v2087_v43, %v321_v7  ;;  %v2228_v26 = vadd.f32 %v2087_v43, %v322_v8 }
  0x92   : > { %v521_v14 = vmul.f32 %v2109_v55, %v508_v60  ;;  %v551_v31 = vadd.f32 %v2087_v43, %v543_v18 }
  0x93   : > { %v407_v46 = vmul.f32 %v2130_v6, %v395_v34  ;;  %v2172_v47 = vmul.f32 %v2130_v6, %v393_v35  ;;  %v538_v34 = vld [vmem:[%s2065_s12 + $0x71] sm:$0xff]  ;;  %v2235_v35 = vadd.f32 %v2087_v43, %v434_v19  ;;  %v341_v9 = vmax.f32 %v2228_v26, 0.0  ;;  %v1588_v19 = vld [vmem:[%s2065_s12 + $0x140] sm:$0xff] }
  0x94   : > { %v546_v60 = vmul.f32 %v2072_v38, %v538_v34  ;;  %v2299_v34 = vld [vmem:[%s2065_s12 + $0x200] sm:$0xff] }
  0x95   : > { %v2180_v51 = vadd.f32 %v518_v16, %v407_v46  ;;  %1042 = vperm.xlu2 %1773, %v1650_v39   ;;  %v1667_v16 = vld [vmem:[%s2817_s1 + $0x1e8] sm:$0xff]  ;;  %v340_v46 = vmax.f32 %v332_v25, 0.0 }
  0x96   : > { %941 = vperm.xlu1 %1772, %v1635_v48   ;;  %931 = vperm.xlu0 %1771, %v1633_v49   ;;  %v324_v48 = vmul.f32 %v2072_v38, %v313_v28  ;;  %v2244_v49 = vld [vmem:[%s2065_s12 + $0x1f0] sm:$0xff]  ;;  %v2273_v12 = vadd.f32 %v2087_v43, %v546_v60 }
  0x97   : > { %v580_v61 = vpop.permute.xlu2 %579  ;;  %v396_v7 = vmul.f32 %v2067_v37, %v340_v46 }
  0x98   : > { %v613_v62 = vmul.f32 %v580_v61, %v556_v50  ;;  %v2195_v63 = vpop.permute.xlu1 %389  ;;  %v385_v0 = vpop.permute.xlu0 %384  ;;  %v1567_v50 = vld [vmem:[%s2065_s12 + $0x100] sm:$0xff]  ;;  %v559_v61 = vmax.f32 %v551_v31, 0.0  ;;  %v2267_v8 = vadd.f32 %v2087_v43, %v324_v48 }
  0x99   : > { %v398_v1 = vmul.f32 %v385_v0, %v342_v52  ;;  %v539_v0 = vmul.f32 %v2072_v38, %v531_v42  ;;  %v436_v5 = vmul.f32 %v2072_v38, %v1567_v50  ;;  %v541_v42 = vmul.f32 %v2072_v38, %v533_v23 }
  0x9a   : > { %v626_v10 = vmul.f32 %v2188_v56, %v613_v62  ;;  %v450_v62 = vmax.f32 %v2235_v35, 0.0  ;;  %v343_v25 = vmax.f32 %v2267_v8, 0.0 }
  0x9b   : > { %v410_v15 = vmul.f32 %v2130_v6, %v398_v1 }
  0x9d   : > { %v2222_v20 = vadd.f32 %v521_v14, %v410_v15  ;;  %1163 = vperm.xlu2 %1773, %v1669_v11   ;;  %v547_v15 = vadd.f32 %v2087_v43, %v539_v0  ;;  %v1591_v0 = vld [vmem:[%s2065_s12 + $0x170] sm:$0xff] }
  0x9e   : > { %1153 = vperm.xlu1 %1772, %v1667_v16   ;;  %1052 = vperm.xlu0 %1771, %v1652_v17  }
  0x9f   : > { %v595_v30 = vpop.permute.xlu2 %594 }
  0xa0   : > { %v475_v32 = vpop.permute.xlu1 %474  ;;  %v470_v33 = vpop.permute.xlu0 %469  ;;  %v616_v16 = vmul.f32 %v595_v30, %v559_v61  ;;  %v562_v30 = vmax.f32 %v2273_v12, 0.0 }
  0xa1   : > { %v504_v39 = vmul.f32 %v475_v32, %v447_v21  ;;  %v503_v40 = vmul.f32 %v470_v33, %v446_v22  ;;  %v534_v21 = vld [vmem:[%s2065_s12 + $0x31] sm:$0xff] }
  0xa2   : > { %v2296_v33 = vld [vmem:[%s2065_s12 + $0x210] sm:$0xff]  ;;  %v542_v41 = vmul.f32 %v2072_v38, %v534_v21  ;;  %v629_v46 = vmul.f32 %v2188_v56, %v616_v16 }
  0xa3   : > { %v517_v54 = vmul.f32 %v2109_v55, %v504_v39  ;;  %v516_v57 = vmul.f32 %v2109_v55, %v503_v40  ;;  %v652_v39 = vmul.f32 %v2072_v38, %v1588_v19  ;;  %v555_v40 = vmax.f32 %v547_v15, 0.0 }
  0xa4   : > { %v655_v19 = vmul.f32 %v2072_v38, %v1591_v0 }
  0xa5   : > { %v2259_v1 = vadd.f32 %v517_v54, %v406_v53  ;;  %v524_v2 = vadd.f32 %v516_v57, %v2172_v47  ;;  %1341 = vrot.lane.b32.xlu2 %v2244_v49, %s1855_s18  ;;  %v397_v47 = vmul.f32 %v2090_v45, %v341_v9  ;;  %v2282_v45 = vadd.f32 %v2087_v43, %v436_v5 }
  0xa6   : > { %1273 = vperm.xlu1 %1772, %v1686_v58   ;;  %1263 = vperm.xlu0 %1771, %v1684_v59   ;;  %v399_v54 = vmul.f32 %v2195_v63, %v343_v25  ;;  %v660_v59 = vadd.f32 %v2087_v43, %v652_v39 }
  0xa7   : > { %v610_v11 = vpop.permute.xlu2 %609  ;;  %v2275_v13 = vadd.f32 %v626_v10, %v524_v2  ;;  %v408_v10 = vmul.f32 %v2130_v6, %v396_v7  ;;  %v409_v28 = vmul.f32 %v2130_v6, %v397_v47  ;;  %v452_v53 = vmax.f32 %v2282_v45, 0.0  ;;  %v537_v47 = vld [vmem:[%s2065_s12 + $0x61] sm:$0xff] }
  0xa8   : > { %v490_v14 = vpop.permute.xlu1 %489  ;;  %v485_v37 = vpop.permute.xlu0 %484  ;;  %v2322_v2 = vadd.f32 %v2087_v43, %v542_v41  ;;  %v619_v5 = vmul.f32 %v610_v11, %v562_v30  ;;  %v411_v15 = vmul.f32 %v2130_v6, %v399_v54  ;;  %v1628_v11 = vld [vmem:[%s2817_s1 + $0x140] sm:$0xff]  ;;  %v668_v21 = vmax.f32 %v660_v59, 0.0 }
  0xa9   : > { %v507_v17 = vmul.f32 %v490_v14, %v450_v62  ;;  %v506_v18 = vmul.f32 %v485_v37, %v449_v3  ;;  %v2325_v3 = vadd.f32 %v2087_v43, %v541_v42  ;;  %v1645_v14 = vld [vmem:[%s2817_s1 + $0x180] sm:$0xff]  ;;  %v536_v37 = vld [vmem:[%s2065_s12 + $0x51] sm:$0xff]  ;;  %v545_v6 = vmul.f32 %v2072_v38, %v537_v47 }
  0xaa   : > { %v558_v23 = vmax.f32 %v2322_v2, 0.0  ;;  %v2360_v42 = vld [vmem:[%s2820_s4 + $0x3] ss:$0 sm:$0xff] }
  0xab   : > { %v520_v31 = vmul.f32 %v2109_v55, %v507_v17  ;;  %v519_v32 = vmul.f32 %v2109_v55, %v506_v18  ;;  %v1630_v18 = vld [vmem:[%s2817_s1 + $0x150] sm:$0xff] }
  0xad   : > { %v2305_v48 = vadd.f32 %v520_v31, %v409_v28  ;;  %v527_v50 = vadd.f32 %v519_v32, %v408_v10  ;;  %1347 = vrot.lane.b32.xlu2 %v2289_v27, %s1855_s18  ;;  %v557_v10 = vmax.f32 %v2325_v3, 0.0  ;;  %v632_v28 = vmul.f32 %v2188_v56, %v619_v5  ;;  %v1587_v5 = vld [vmem:[%s2065_s12 + $0x130] sm:$0xff] }
  0xae   : > { %1345 = vrot.lane.b32.xlu0 %v2296_v33, %s1855_s18  ;;  %1343 = vrot.lane.b32.xlu1 %v2299_v34, %s1855_s18  ;;  %v544_v32 = vmul.f32 %v2072_v38, %v536_v37  ;;  %v1647_v37 = vld [vmem:[%s2817_s1 + $0x190] sm:$0xff] }
  0xaf   : > { %v696_v57 = vpop.permute.xlu2 %695  ;;  %v2317_v58 = vadd.f32 %v629_v46, %v527_v50  ;;  %v2363_v50 = vadd.f32 %v2087_v43, %v545_v6 }
  0xb0   : > { %v575_v60 = vpop.permute.xlu1 %574  ;;  %v500_v61 = vpop.permute.xlu0 %499  ;;  %v725_v54 = vmul.f32 %v696_v57, %v668_v21  ;;  %v2373_v0 = vadd.f32 %v2087_v43, %v544_v32 }
  0xb1   : > { %v612_v7 = vmul.f32 %v575_v60, %v555_v40  ;;  %v509_v63 = vmul.f32 %v500_v61, %v452_v53  ;;  %v663_v40 = vadd.f32 %v2087_v43, %v655_v19  ;;  %v2370_v61 = vld [vmem:[%s2065_s12 + $0x1b0] sm:$0xff] }
  0xb2   : > { %v738_v19 = vmul.f32 %v2360_v42, %v725_v54 }
  0xb3   : > { %v625_v16 = vmul.f32 %v2188_v56, %v612_v7  ;;  %v522_v17 = vmul.f32 %v2109_v55, %v509_v63  ;;  %v1586_v7 = vld [vmem:[%s2065_s12 + $0x120] sm:$0xff]  ;;  %v1664_v63 = vld [vmem:[%s2817_s1 + $0x1d0] sm:$0xff]  ;;  %v671_v47 = vmax.f32 %v663_v40, 0.0 }
  0xb5   : > { %v2351_v55 = vadd.f32 %v625_v16, %v2152_v24  ;;  %v530_v31 = vadd.f32 %v522_v17, %v411_v15  ;;  %1017 = vperm.xlu2 %1773, %v1645_v14   ;;  %v1662_v15 = vld [vmem:[%s2817_s1 + $0x1c0] sm:$0xff]  ;;  %v761_v16 = vmul.f32 %v2072_v38, %v2370_v61  ;;  %v561_v17 = vmax.f32 %v2363_v50, 0.0 }
  0xb6   : > { %906 = vperm.xlu0 %1771, %v1628_v11   ;;  %916 = vperm.xlu1 %1772, %v1630_v18   ;;  %v651_v11 = vmul.f32 %v2072_v38, %v1587_v5  ;;  %v650_v18 = vmul.f32 %v2072_v38, %v1586_v7  ;;  %v2409_v5 = vld [vmem:[%s2065_s12 + $0x1e0] sm:$0xff]  ;;  %v1629_v7 = vld [vmem:[%s2817_s1 + $0x148] sm:$0xff] }
  0xb7   : > { %v711_v39 = vpop.permute.xlu2 %710  ;;  %v2355_v41 = vadd.f32 %v632_v28, %v530_v31  ;;  %v560_v28 = vmax.f32 %v2373_v0, 0.0  ;;  %v769_v40 = vadd.f32 %v2087_v43, %v761_v16  ;;  %v2622_v0 = vld [vmem:[%s2821_s5] ss:$0 sm:$0xff] }
  0xb8   : > { %v590_v24 = vpop.permute.xlu1 %589  ;;  %v585_v46 = vpop.permute.xlu0 %584  ;;  %v659_v54 = vadd.f32 %v2087_v43, %v651_v11 }
  0xb9   : > { %v615_v59 = vmul.f32 %v590_v24, %v558_v23  ;;  %v614_v60 = vmul.f32 %v585_v46, %v557_v10 }
  0xba   : > { %v667_v16 = vmax.f32 %v659_v54, 0.0 }
  0xbb   : > { %v628_v57 = vmul.f32 %v2188_v56, %v615_v59  ;;  %v627_v14 = vmul.f32 %v2188_v56, %v614_v60  ;;  %v728_v59 = vmul.f32 %v711_v39, %v671_v47  ;;  %v1679_v39 = vld [vmem:[%s2817_s1 + $0x200] sm:$0xff]  ;;  %v1681_v47 = vld [vmem:[%s2817_s1 + $0x210] sm:$0xff] }
  0xbd   : > { %v2395_v21 = vadd.f32 %v628_v57, %v2180_v51  ;;  %v635_v6 = vadd.f32 %v627_v14, %v2259_v1  ;;  %1138 = vperm.xlu2 %1773, %v1664_v63   ;;  %v658_v51 = vadd.f32 %v2087_v43, %v650_v18  ;;  %v1589_v63 = vld [vmem:[%s2065_s12 + $0x150] sm:$0xff]  ;;  %v741_v18 = vmul.f32 %v2360_v42, %v728_v59 }
  0xbe   : > { %1027 = vperm.xlu0 %1771, %v1647_v37   ;;  %1128 = vperm.xlu1 %1772, %v1662_v15   ;;  %v777_v37 = vmax.f32 %v769_v40, 0.0  ;;  %v764_v15 = vmul.f32 %v2072_v38, %v2409_v5 }
  0xbf   : > { %v797_v31 = vpop.permute.xlu2 %796  ;;  %v2399_v32 = vadd.f32 %v738_v19, %v635_v6  ;;  %v666_v11 = vmax.f32 %v658_v51, 0.0  ;;  %v653_v6 = vmul.f32 %v2072_v38, %v1589_v63  ;;  %v1648_v63 = vld [vmem:[%s2817_s1 + $0x198] sm:$0xff] }
  0xc0   : > { %v605_v24 = vpop.permute.xlu1 %604  ;;  %v600_v46 = vpop.permute.xlu0 %599  ;;  %v834_v59 = vmul.f32 %v797_v31, %v777_v37  ;;  %v1646_v31 = vld [vmem:[%s2817_s1 + $0x188] sm:$0xff] }
  0xc1   : > { %v618_v1 = vmul.f32 %v605_v24, %v561_v17  ;;  %v617_v60 = vmul.f32 %v600_v46, %v560_v28  ;;  %v772_v46 = vadd.f32 %v2087_v43, %v764_v15 }
  0xc3   : > { %v631_v57 = vmul.f32 %v2188_v56, %v618_v1  ;;  %v630_v14 = vmul.f32 %v2188_v56, %v617_v60  ;;  %v661_v60 = vadd.f32 %v2087_v43, %v653_v6  ;;  %v780_v37 = vmax.f32 %v772_v46, 0.0 }
  0xc5   : > { %v2427_v19 = vadd.f32 %v631_v57, %v2222_v20  ;;  %v638_v56 = vadd.f32 %v630_v14, %v2305_v48  ;;  %911 = vperm.xlu2 %1773, %v1629_v7   ;;  %v2437_v20 = vld [vmem:[%s2820_s4 + $0x4] ss:$0 sm:$0xff] }
  0xc6   : > { %1238 = vperm.xlu0 %1771, %v1679_v39   ;;  %1248 = vperm.xlu1 %1772, %v1681_v47   ;;  %v1592_v7 = vld [vmem:[%s2065_s12 + $0x180] sm:$0xff]  ;;  %v1631_v39 = vld [vmem:[%s2817_s1 + $0x158] sm:$0xff]  ;;  %v767_v47 = vmul.f32 %v2072_v38, %v2296_v33 }
  0xc7   : > { %v812_v24 = vpop.permute.xlu2 %811  ;;  %v2431_v40 = vadd.f32 %v741_v18, %v638_v56  ;;  %v656_v15 = vmul.f32 %v2072_v38, %v1592_v7  ;;  %v669_v56 = vmax.f32 %v661_v60, 0.0  ;;  %v2471_v60 = vld [vmem:[%s2065_s12 + $0x1c0] sm:$0xff] }
  0xc8   : > { %v691_v54 = vpop.permute.xlu1 %690  ;;  %v686_v51 = vpop.permute.xlu0 %685  ;;  %v775_v33 = vadd.f32 %v2087_v43, %v767_v47 }
  0xc9   : > { %v724_v1 = vmul.f32 %v691_v54, %v667_v16  ;;  %v723_v48 = vmul.f32 %v686_v51, %v666_v11  ;;  %v847_v16 = vmul.f32 %v2437_v20, %v834_v59  ;;  %v664_v59 = vadd.f32 %v2087_v43, %v656_v15 }
  0xca   : > { %v762_v15 = vmul.f32 %v2072_v38, %v2471_v60 }
  0xcb   : > { %v737_v57 = vmul.f32 %v2360_v42, %v724_v1  ;;  %v736_v14 = vmul.f32 %v2360_v42, %v723_v48  ;;  %v1605_v48 = vld [vmem:[%s2065_s12 + $0x1d0] sm:$0xff] }
  0xcd   : > { %v2457_v11 = vadd.f32 %v737_v57, %v2275_v13  ;;  %v744_v18 = vadd.f32 %v736_v14, %v2351_v55  ;;  %1032 = vperm.xlu2 %1773, %v1648_v63   ;;  %v837_v13 = vmul.f32 %v812_v24, %v780_v37  ;;  %v1680_v55 = vld [vmem:[%s2817_s1 + $0x208] sm:$0xff]  ;;  %v1665_v57 = vld [vmem:[%s2817_s1 + $0x1d8] sm:$0xff]  ;;  %v783_v14 = vmax.f32 %v775_v33, 0.0  ;;  %v1590_v24 = vld [vmem:[%s2065_s12 + $0x160] sm:$0xff] }
  0xce   : > { %921 = vperm.xlu0 %1771, %v1631_v39   ;;  %1022 = vperm.xlu1 %1772, %v1646_v31   ;;  %v1663_v63 = vld [vmem:[%s2817_s1 + $0x1c8] sm:$0xff]  ;;  %v672_v39 = vmax.f32 %v664_v59, 0.0  ;;  %v763_v37 = vmul.f32 %v2072_v38, %v1605_v48 }
  0xcf   : > { %v827_v6 = vpop.permute.xlu2 %826  ;;  %v2460_v54 = vadd.f32 %v847_v16, %v744_v18  ;;  %v850_v31 = vmul.f32 %v2437_v20, %v837_v13  ;;  %v654_v16 = vmul.f32 %v2072_v38, %v1590_v24  ;;  %v766_v24 = vmul.f32 %v2072_v38, %v2299_v34 }
  0xd0   : > { %v2463_v46 = vpop.permute.xlu1 %705  ;;  %v701_v51 = vpop.permute.xlu0 %700  ;;  %v840_v59 = vmul.f32 %v827_v6, %v783_v14  ;;  %v1373_v6 = vld [vmem:[%s2822_s6 + $0x38] sm:$0xff] }
  0xd1   : > { %v726_v1 = vmul.f32 %v701_v51, %v669_v56  ;;  %1703 = vmatpush.msra.mxu2 %v1373_v6  ;;  %1704 = vmatpush.msra.mxu3 %v1373_v6 }
  0xd2   : > { %v853_v14 = vmul.f32 %v2437_v20, %v840_v59  ;;  %1702 = vmatpush.msra.mxu1 %v1373_v6  ;;  %1411 = vmatpush.msra.mxu0 %v1373_v6 }
  0xd3   : > { %v739_v7 = vmul.f32 %v2360_v42, %v726_v1  ;;  %v770_v1 = vadd.f32 %v2087_v43, %v762_v15 }
  0xd5   : > { %v747_v47 = vadd.f32 %v739_v7, %v2395_v21  ;;  %1243 = vperm.xlu2 %1773, %v1680_v55   ;;  %v771_v21 = vadd.f32 %v2087_v43, %v763_v37  ;;  %v662_v55 = vadd.f32 %v2087_v43, %v654_v16 }
  0xd6   : > { %1133 = vperm.xlu0 %1771, %v1663_v63   ;;  %1143 = vperm.xlu1 %1772, %v1665_v57   ;;  %v1682_v63 = vld [vmem:[%s2817_s1 + $0x218] sm:$0xff]  ;;  %v765_v57 = vmul.f32 %v2072_v38, %v2244_v49  ;;  %v1372_v49 = vld [vmem:[%s2822_s6 + $0x30] sm:$0xff] }
  0xd7   : > { %v2487_v18 = vpop.permute.xlu2 %1037  ;;  %v2489_v56 = vadd.f32 %v850_v31, %v747_v47  ;;  %v779_v31 = vmax.f32 %v771_v21, 0.0  ;;  %v778_v47 = vmax.f32 %v770_v1, 0.0  ;;  %v670_v34 = vmax.f32 %v662_v55, 0.0  ;;  %1706 = vmatpush.msra.mxu2 %v1372_v49  ;;  %1707 = vmatpush.msra.mxu3 %v1372_v49  ;;  %v1370_v21 = vld [vmem:[%s2822_s6 + $0x20] sm:$0xff] }
  0xd8   : > { %v2491_v33 = vpop.permute.xlu1 %720  ;;  %v716_v51 = vpop.permute.xlu0 %715  ;;  %1705 = vmatpush.msra.mxu1 %v1372_v49  ;;  %1412 = vmatpush.msra.mxu0 %v1372_v49 }
  0xd9   : > { %v729_v13 = vmul.f32 %v716_v51, %v672_v39  ;;  %v1371_v51 = vld [vmem:[%s2822_s6 + $0x28] sm:$0xff]  ;;  %v727_v1 = vmul.f32 %v2463_v46, %v670_v34 }
  0xda   : > { %1709 = vmatpush.msra.mxu2 %v1371_v51  ;;  %1710 = vmatpush.msra.mxu3 %v1371_v51  ;;  %v1624_v46 = vld [vmem:[%s2065_s12 + $0x161] sm:$0xff] }
  0xdb   : > { %v742_v7 = vmul.f32 %v2360_v42, %v729_v13  ;;  %v773_v13 = vadd.f32 %v2087_v43, %v765_v57  ;;  %1708 = vmatpush.msra.mxu1 %v1371_v51  ;;  %1413 = vmatpush.msra.mxu0 %v1371_v51  ;;  %v875_v34 = vmul.f32 %v2072_v38, %v1624_v46  ;;  %v1593_v51 = vld [vmem:[%s2065_s12 + $0x190] sm:$0xff]  ;;  %v1626_v46 = vld [vmem:[%s2065_s12 + $0x181] sm:$0xff] }
  0xdc   : > { %1712 = vmatpush.msra.mxu2 %v1370_v21  ;;  %1713 = vmatpush.msra.mxu3 %v1370_v21 }
  0xdd   : > { %v750_v39 = vadd.f32 %v742_v7, %v2427_v19  ;;  %1337 = vrot.lane.b32.xlu2 %v1605_v48, %s1855_s18  ;;  %v774_v48 = vadd.f32 %v2087_v43, %v766_v24  ;;  %1711 = vmatpush.msra.mxu1 %v1370_v21 }
  0xde   : > { %1253 = vperm.xlu0 %1771, %v1682_v63   ;;  %1333 = vrot.lane.b32.xlu1 %v2370_v61, %s1855_s18  ;;  %v1369_v63 = vld [vmem:[%s2822_s6 + $0x18] sm:$0xff] }
  0xdf   : > { %v2515_v37 = vpop.permute.xlu2 %1158  ;;  %v2517_v15 = vadd.f32 %v853_v14, %v750_v39  ;;  %v782_v6 = vmax.f32 %v774_v48, 0.0  ;;  %v781_v14 = vmax.f32 %v773_v13, 0.0  ;;  %1715 = vmatpush.msra.mxu2 %v1369_v63  ;;  %v1368_v39 = vld [vmem:[%s2822_s6 + $0x10] sm:$0xff]  ;;  %1716 = vmatpush.msra.mxu3 %v1369_v63 }
  0xe0   : > { %v807_v19 = vpop.permute.xlu1 %806  ;;  %v802_v16 = vpop.permute.xlu0 %801  ;;  %1714 = vmatpush.msra.mxu1 %v1369_v63  ;;  %1414 = vmatpush.msra.mxu0 %v1370_v21 }
  0xe1   : > { %v836_v61 = vmul.f32 %v807_v19, %v779_v31  ;;  %v835_v59 = vmul.f32 %v802_v16, %v778_v47  ;;  %1718 = vmatpush.msra.mxu2 %v1368_v39  ;;  %v1366_v19 = vld [vmem:[%s2822_s6] sm:$0xff]  ;;  %1719 = vmatpush.msra.mxu3 %v1368_v39 }
  0xe2   : > { %1717 = vmatpush.msra.mxu1 %v1368_v39  ;;  %1415 = vmatpush.msra.mxu0 %v1369_v63 }
  0xe3   : > { %v849_v55 = vmul.f32 %v2437_v20, %v836_v61  ;;  %v848_v7 = vmul.f32 %v2437_v20, %v835_v59 }
  0xe4   : > { %1416 = vmatpush.msra.mxu0 %v1368_v39 }
  0xe5   : > { %v2534_v57 = vadd.f32 %v849_v55, %v2399_v32  ;;  %v2537_v24 = vadd.f32 %v848_v7, %v2457_v11  ;;  %v740_v32 = vmul.f32 %v2360_v42, %v727_v1  ;;  %v883_v1 = vadd.f32 %v2087_v43, %v875_v34  ;;  %v2585_v34 = vld [vmem:[%s2820_s4 + $0x6] ss:$0 sm:$0xff] }
  0xe6   : > { %1335 = vrot.lane.b32.xlu0 %v2471_v60, %s1855_s18  ;;  %1339 = vrot.lane.b32.xlu1 %v2409_v5, %s1855_s18  ;;  %v1367_v60 = vld [vmem:[%s2822_s6 + $0x8] sm:$0xff]  ;;  %s1488_s18 = scalar_lea.hbm %s2824_s8, %s1701_s21 }
  0xe7   : > { %v2548_v31 = vpop.permute.xlu2 %1268  ;;  %1721 = vmatpush.msra.mxu2 %v1367_v60  ;;  %v748_v16 = vadd.f32 %v740_v32, %v2317_v58  ;;  %1722 = vmatpush.msra.mxu3 %v1367_v60  ;;  %v657_v58 = vmul.f32 %v2072_v38, %v1593_v51  ;;  %v891_v63 = vmax.f32 %v883_v1, 0.0  ;;  %v2597_v51 = vld [vmem:[%s2820_s4 + $0x7] ss:$0 sm:$0xff]  ;;  %s1491_s26 = sshll.u32 %s1488_s18, 4  ;;  %s1492_s26 = int_to_ptr.hbm [resolvable:$true] %s1491_s26 }
  0xe8   : > { %v822_v11 = vpop.permute.xlu1 %821  ;;  %v817_v47 = vpop.permute.xlu0 %816  ;;  %1720 = vmatpush.msra.mxu1 %v1367_v60  ;;  %1417 = vmatpush.msra.mxu0 %v1367_v60  ;;  %s1804_s10 = sshra.s32 %s1492_s26, 4  ;;  %s1805_s10 = int_to_ptr.hbm [resolvable:$true] %s1804_s10 }
  0xe9   : > { %v839_v5 = vmul.f32 %v822_v11, %v782_v6  ;;  %v838_v49 = vmul.f32 %v817_v47, %v781_v14  ;;  %1724 = vmatpush.msra.mxu2 %v1366_v19  ;;  %1725 = vmatpush.msra.mxu3 %v1366_v19  ;;  %v768_v6 = vmul.f32 %v2072_v38, %v2289_v27  ;;  %v2574_v14 = vld [vmem:[%s2820_s4 + $0x5] ss:$0 sm:$0xff]  ;;  %p1811_p0 = scmp.lt.s32.totalorder %s1805_s10, %s2824_s8 }
  0xea   : > { %1723 = vmatpush.msra.mxu1 %v1366_v19  ;;  %1418 = vmatpush.msra.mxu0 %v1366_v19  ;;  %v877_v47 = vmul.f32 %v2072_v38, %v1626_v46  ;;  %v1059_v19 = vmul.f32 %v2487_v18, %v341_v9 }
  0xeb   : > { %v852_v48 = vmul.f32 %v2437_v20, %v839_v5  ;;  %v851_v61 = vmul.f32 %v2437_v20, %v838_v49  ;;  %v776_v27 = vadd.f32 %v2087_v43, %v768_v6 }
  0xec   : > { %v1072_v26 = vmul.f32 %v2585_v34, %v1059_v19 }
  0xed   : > { %v2562_v59 = vadd.f32 %v852_v48, %v2431_v40  ;;  %v859_v13 = vadd.f32 %v851_v61, %v748_v16  ;;  %v665_v40 = vadd.f32 %v2087_v43, %v657_v58  ;;  %v885_v61 = vadd.f32 %v2087_v43, %v877_v47  ;;  %v1644_v47 = vld [vmem:[%s2065_s12 + $0x80] sm:$0xff] }
  0xee   : > { %v784_v58 = vmax.f32 %v776_v27, 0.0 }
  0xef   : > { %v2566_v21 = vpop.permute.xlu2 %1042  ;;  %v673_v32 = vmax.f32 %v665_v40, 0.0 }
  0xf0   : > { %v937_v55 = vpop.permute.xlu1 %936  ;;  %v927_v7 = vpop.permute.xlu0 %926  ;;  %v1060_v12 = vmul.f32 %v2566_v21, %v342_v52 }
  0xf1   : > { %v948_v39 = vmul.f32 %v927_v7, %v891_v63  ;;  %v730_v16 = vmul.f32 %v2491_v33, %v673_v32  ;;  %v1627_v7 = vld [vmem:[%s2065_s12 + $0x191] sm:$0xff] }
  0xf2   : > { %v1625_v63 = vld [vmem:[%s2065_s12 + $0x171] sm:$0xff]  ;;  %v878_v6 = vmul.f32 %v2072_v38, %v1627_v7 }
  0xf3   : > { %v961_v49 = vmul.f32 %v2574_v14, %v948_v39  ;;  %v743_v9 = vmul.f32 %v2360_v42, %v730_v16  ;;  %v876_v42 = vmul.f32 %v2072_v38, %v1625_v63 }
  0xf5   : > { %v969_v1 = vadd.f32 %v961_v49, %v859_v13  ;;  %v2608_v13 = vld [vmem:[%s2820_s4 + $0x8] ss:$0 sm:$0xff] }
  0xf7   : > { %v2577_v11 = vpop.permute.xlu2 %1163  ;;  %v1080_v46 = vadd.f32 %v1072_v26, %v969_v1 }
  0xf8   : > { %v1149_v60 = vpop.permute.xlu1 %1148  ;;  %v1048_v5 = vpop.permute.xlu0 %1047 }
  0xf9   : > { %v1170_v48 = vmul.f32 %v1149_v60, %v450_v62  ;;  %v893_v62 = vmax.f32 %v885_v61, 0.0  ;;  %v751_v60 = vadd.f32 %v743_v9, %v2355_v41  ;;  %v1661_v61 = vld [vmem:[%s2065_s12 + $0x110] sm:$0xff]  ;;  %v989_v41 = vmul.f32 %v2072_v38, %v1644_v47 }
  0xfa   : > { %v1061_v7 = vmul.f32 %v1048_v5, %v343_v25  ;;  %v1100_v26 = vmul.f32 %v2072_v38, %v1661_v61  ;;  %v1678_v25 = vld [vmem:[%s2065_s12 + $0x81] sm:$0xff]  ;;  %v2660_v61 = vld [vmem:[%s2819_s3] ss:$0 sm:$0xff] }
  0xfb   : > { %v1183_v18 = vmul.f32 %v2597_v51, %v1170_v48  ;;  %v950_v16 = vmul.f32 %v937_v55, %v893_v62  ;;  %v886_v48 = vadd.f32 %v2087_v43, %v878_v6  ;;  %v997_v6 = vadd.f32 %v2087_v43, %v989_v41 }
  0xfc   : > { %v1074_v8 = vmul.f32 %v2585_v34, %v1061_v7 }
  0xfd   : > { %v1191_v49 = vadd.f32 %v1183_v18, %v1080_v46  ;;  %v963_v63 = vmul.f32 %v2574_v14, %v950_v16  ;;  %v894_v18 = vmax.f32 %v886_v48, 0.0  ;;  %v1172_v46 = vmul.f32 %v2515_v37, %v452_v53 }
  0xfe   : > { %v1005_v47 = vmax.f32 %v997_v6, 0.0 }
  0xff   : > { %v1342_v35 = vpop.permute.xlu2 %1341  ;;  %v971_v38 = vadd.f32 %v963_v63, %v2517_v15  ;;  %v1185_v53 = vmul.f32 %v2597_v51, %v1172_v46 }
 0x100   : > { %v1259_v33 = vpop.permute.xlu1 %1258  ;;  %v832_v40 = vpop.permute.xlu0 %831 }
 0x101   : > { %v1280_v39 = vmul.f32 %v1259_v33, %v560_v28  ;;  %v841_v32 = vmul.f32 %v832_v40, %v784_v58  ;;  %v884_v58 = vadd.f32 %v2087_v43, %v876_v42 }
 0x103   : > { %v1293_v27 = vmul.f32 %v2608_v13, %v1280_v39  ;;  %v854_v19 = vmul.f32 %v2437_v20, %v841_v32  ;;  %v892_v33 = vmax.f32 %v884_v58, 0.0  ;;  %v1108_v39 = vadd.f32 %v2087_v43, %v1100_v26 }
 0x104   : > { %v1282_v43 = vmul.f32 %v2548_v31, %v562_v30 }
 0x105   : > { %v1301_v28 = vadd.f32 %v1293_v27, %v1191_v49  ;;  %v862_v1 = vadd.f32 %v854_v19, %v751_v60  ;;  %v2646_v60 = vld [vmem:[%s2818_s2] ss:$0 sm:$0xff]  ;;  %v1082_v49 = vadd.f32 %v1074_v8, %v971_v38  ;;  %v1116_v37 = vmax.f32 %v1108_v39, 0.0  ;;  %v1622_v38 = vld [vmem:[%s2065_s12 + $0x141] sm:$0xff] }
 0x106   : > { %v1295_v41 = vmul.f32 %v2608_v13, %v1282_v43 }
 0x107   : > { %v1313_v20 = vadd.f32 %v2622_v0, %v1301_v28  ;;  %v2629_v55 = vpop.permute.xlu2 %1347  ;;  %v1193_v58 = vadd.f32 %v1185_v53, %v1082_v49  ;;  %v1173_v7 = vmul.f32 %v2577_v11, %v1116_v37  ;;  %v873_v49 = vmul.f32 %v2646_v60, %v1622_v38  ;;  %v1639_v53 = vld [vmem:[%s2065_s12 + $0x30] sm:$0xff] }
 0x108   : > { %v942_v9 = vpop.permute.xlu1 %941  ;;  %v932_v62 = vpop.permute.xlu0 %931 }
 0x109   : > { %v1321_v40 = vmax.f32 %v1313_v20, 0.0  ;;  %v951_v32 = vmul.f32 %v942_v9, %v894_v18  ;;  %v949_v42 = vmul.f32 %v932_v62, %v892_v33  ;;  %v1303_v9 = vadd.f32 %v1295_v41, %v1193_v58 }
 0x10a   : > { %v1073_v18 = vmul.f32 %v2585_v34, %v1060_v12 }
 0x10b   : > { %v1362_v5 = vsel %vm1357_vm0, %v1321_v40, %v1342_v35  ;;  %v1210_v35 = vmul.f32 %v2646_v60, %v1678_v25  ;;  %v964_v19 = vmul.f32 %v2574_v14, %v951_v32  ;;  %v962_v16 = vmul.f32 %v2574_v14, %v949_v42 }
 0x10c   : > { %1692 = vmatmul.msk.f32.vlgmr.msra.gmra.mxu2 %vm1378_vm1, %v1362_v5 }
 0x10d   : > { %v1218_v28 = vadd.f32 %v2660_v61, %v1210_v35  ;;  %v972_v20 = vadd.f32 %v964_v19, %v862_v1  ;;  %v970_v63 = vadd.f32 %v962_v16, %v2562_v59  ;;  %v1315_v59 = vadd.f32 %v2622_v0, %v1303_v9  ;;  %v1656_v16 = vld [vmem:[%s2065_s12 + $0xc0] sm:$0xff] }
 0x10e   : > { %v984_v19 = vmul.f32 %v2646_v60, %v1639_v53  ;;  %v1095_v12 = vmul.f32 %v2646_v60, %v1656_v16 }
 0x10f   : > { %v2649_v45 = vpop.permute.xlu2 %1017  ;;  %v1226_v26 = vmax.f32 %v1218_v28, 0.0  ;;  %v1081_v62 = vadd.f32 %v1073_v18, %v970_v63  ;;  %v1323_v32 = vmax.f32 %v1315_v59, 0.0 }
 0x110   : > { %v1154_v15 = vpop.permute.xlu1 %1153  ;;  %v1053_v27 = vpop.permute.xlu0 %1052  ;;  %v992_v41 = vadd.f32 %v2660_v61, %v984_v19  ;;  %v1655_v19 = vld [vmem:[%s2065_s12 + $0xb0] sm:$0xff] }
 0x111   : > { %v1062_v48 = vmul.f32 %v1053_v27, %v1005_v47  ;;  %v1171_v30 = vmul.f32 %v1154_v15, %v451_v44  ;;  %v1186_v44 = vmul.f32 %v2597_v51, %v1173_v7  ;;  %v881_v15 = vadd.f32 %v2660_v61, %v873_v49 }
 0x112   : > { %v1000_v9 = vmax.f32 %v992_v41, 0.0 }
 0x113   : > { %v1075_v31 = vmul.f32 %v2585_v34, %v1062_v48  ;;  %v1184_v36 = vmul.f32 %v2597_v51, %v1171_v30  ;;  %v1620_v48 = vld [vmem:[%s2065_s12 + $0x121] sm:$0xff]  ;;  %v889_v30 = vmax.f32 %v881_v15, 0.0 }
 0x114   : > { %v871_v7 = vmul.f32 %v2646_v60, %v1620_v48  ;;  %v1640_v48 = vld [vmem:[%s2065_s12 + $0x40] sm:$0xff] }
 0x115   : > { %v1083_v52 = vadd.f32 %v1075_v31, %v972_v20  ;;  %v1192_v40 = vadd.f32 %v1184_v36, %v1081_v62  ;;  %v1103_v20 = vadd.f32 %v2660_v61, %v1095_v12  ;;  %v1671_v36 = vld [vmem:[%s2065_s12 + $0x11] sm:$0xff] }
 0x116   : > { %v879_v18 = vadd.f32 %v2660_v61, %v871_v7  ;;  %v1621_v62 = vld [vmem:[%s2065_s12 + $0x131] sm:$0xff]  ;;  %v1203_v59 = vmul.f32 %v2646_v60, %v1671_v36 }
 0x117   : > { %v1139_v1 = vpop.permute.xlu2 %1138  ;;  %v1194_v6 = vadd.f32 %v1186_v44, %v1083_v52  ;;  %v1789_v52 = vld [vmem:[%s2065_s12 + $0x10] sm:$0xff]  ;;  %v1111_v44 = vmax.f32 %v1103_v20, 0.0  ;;  %v1094_v20 = vmul.f32 %v2646_v60, %v1655_v19 }
 0x118   : > { %v1274_v21 = vpop.permute.xlu1 %1273  ;;  %v1264_v29 = vpop.permute.xlu0 %1263 }
 0x119   : > { %v1283_v33 = vmul.f32 %v1274_v21, %v1226_v26  ;;  %v1281_v11 = vmul.f32 %v1264_v29, %v561_v17  ;;  %v982_v21 = vmul.f32 %v1789_v52, %v2646_v60 }
 0x11b   : > { %v1296_v8 = vmul.f32 %v2608_v13, %v1283_v33  ;;  %v1294_v25 = vmul.f32 %v2608_v13, %v1281_v11 }
 0x11d   : > { %v1304_v5 = vadd.f32 %v1296_v8, %v1194_v6  ;;  %v1302_v46 = vadd.f32 %v1294_v25, %v1192_v40  ;;  %v887_v40 = vmax.f32 %v879_v18, 0.0  ;;  %v990_v8 = vadd.f32 %v2660_v61, %v982_v21 }
 0x11e   : > { %v872_v25 = vmul.f32 %v2646_v60, %v1621_v62 }
 0x11f   : > { %v1314_v39 = vadd.f32 %v2622_v0, %v1302_v46  ;;  %v1316_v42 = vadd.f32 %v2622_v0, %v1304_v5  ;;  %v2687_v43 = vpop.permute.xlu2 %911  ;;  %v1638_v5 = vld [vmem:[%s2065_s12 + $0x20] sm:$0xff]  ;;  %v1168_v46 = vmul.f32 %v1139_v1, %v1111_v44 }
 0x120   : > { %v1346_v50 = vpop.permute.xlu0 %1345  ;;  %v1344_v17 = vpop.permute.xlu1 %1343  ;;  %v880_v49 = vadd.f32 %v2660_v61, %v872_v25 }
 0x121   : > { %v1364_v47 = vsel %vm1357_vm0, %v1323_v32, %v1346_v50  ;;  %v1322_v35 = vmax.f32 %v1314_v39, 0.0  ;;  %v1324_v27 = vmax.f32 %v1316_v42, 0.0  ;;  %v1211_v39 = vadd.f32 %v2660_v61, %v1203_v59  ;;  %v1623_v32 = vld [vmem:[%s2065_s12 + $0x151] sm:$0xff] }
 0x122   : > { %1694 = vmatmul.msk.f32.vlgmr.msra.gmra.mxu3 %vm1378_vm1, %v1364_v47  ;;  %v983_v47 = vmul.f32 %v2646_v60, %v1638_v5  ;;  %v1181_v1 = vmul.f32 %v2597_v51, %v1168_v46  ;;  %v874_v15 = vmul.f32 %v2646_v60, %v1623_v32  ;;  %v888_v41 = vmax.f32 %v880_v49, 0.0 }
 0x123   : > { %v1363_v37 = vsel %vm1357_vm0, %v1322_v35, %v1344_v17  ;;  %v1365_v31 = vsel %vm1357_vm0, %v1324_v27, %v2629_v55  ;;  %v998_v35 = vmax.f32 %v990_v8, 0.0  ;;  %v1219_v27 = vmax.f32 %v1211_v39, 0.0 }
 0x124   : > { %1693 = vmatmul.msk.f32.gmra.mxu2 %vm1378_vm1, %v1363_v37  ;;  %v991_v12 = vadd.f32 %v2660_v61, %v983_v47  ;;  %v882_v7 = vadd.f32 %v2660_v61, %v874_v15 }
 0x126   : > { %v890_v62 = vmax.f32 %v882_v7, 0.0 }
 0x127   : > { %v2702_v26 = vpop.permute.xlu2 %1032 }
 0x128   : > { %v907_v28 = vpop.permute.xlu0 %906  ;;  %v917_v58 = vpop.permute.xlu1 %916 }
 0x129   : > { %v946_v63 = vmul.f32 %v917_v58, %v889_v30  ;;  %v944_v50 = vmul.f32 %v907_v28, %v887_v40  ;;  %v1657_v30 = vld [vmem:[%s2065_s12 + $0xd0] sm:$0xff]  ;;  %v1674_v40 = vld [vmem:[%s2065_s12 + $0x41] sm:$0xff]  ;;  %s1806_s12 = scalar_lea.hbm %s1805_s10, 32 }
 0x12a   : > { %1695 = vmatmul.msk.f32.gmra.mxu3 %vm1378_vm1, %v1365_v31  ;;  %v1055_v31 = vmul.f32 %v2649_v45, %v998_v35  ;;  %v999_v45 = vmax.f32 %v991_v12, 0.0  ;;  %v1206_v32 = vmul.f32 %v2646_v60, %v1674_v40  ;;  %p1807_p11 = scmp.ne.s32.totalorder %s1805_s10, %s1806_s12  ;;  %p1812_p1 = scmp.lt.s32.totalorder %s1810_s20, %s1806_s12 }
 0x12b   : > { %v959_v33 = vmul.f32 %v2574_v14, %v946_v63  ;;  %v957_v16 = vmul.f32 %v2574_v14, %v944_v50  ;;  %v985_v63 = vmul.f32 %v2646_v60, %v1640_v48 }
 0x12c   : > { %v1068_v4 = vmul.f32 %v2585_v34, %v1055_v31  ;;  %p1808_p12 = pnand %p1807_p11, %p1942_p5  ;;  %p1813_p2 = por %p1812_p1, %p1811_p0 }
 0x12d   : > { %v967_v38 = vadd.f32 %v959_v33, %v2534_v57  ;;  %v965_v18 = vadd.f32 %v957_v16, %v2460_v54  ;;  %v993_v59 = vadd.f32 %v2660_v61, %v985_v63 }
 0x12e   : > { %p1809_p13 = pneg %p1808_p12 }
 0x12f   : > { %v1244_v42 = vpop.permute.xlu2 %1243  ;;  %v1001_v50 = vmax.f32 %v993_v59, 0.0 }
 0x130   : > { %v1028_v55 = vpop.permute.xlu0 %1027  ;;  %v1129_v29 = vpop.permute.xlu1 %1128  ;;  %p1814_p3 = pnand %p1813_p2, %p1809_p13 }
 0x131   : > { %v1057_v11 = vmul.f32 %v1028_v55, %v1000_v9  ;;  %v1166_v2 = vmul.f32 %v1129_v29, %v446_v22  ;;  %v1096_v9 = vmul.f32 %v2646_v60, %v1657_v30  ;;  %v945_v22 = vmul.f32 %v2687_v43, %v888_v41 }
 0x132   : > { %v1058_v19 = vmul.f32 %v2702_v26, %v1001_v50 }
 0x133   : > { %v1070_v6 = vmul.f32 %v2585_v34, %v1057_v11  ;;  %v1179_v44 = vmul.f32 %v2597_v51, %v1166_v2  ;;  %v1102_v11 = vadd.f32 %v2660_v61, %v1094_v20  ;;  %v1104_v54 = vadd.f32 %v2660_v61, %v1096_v9 }
 0x134   : > { %v958_v43 = vmul.f32 %v2574_v14, %v945_v22 }
 0x135   : > { %v1078_v17 = vadd.f32 %v1070_v6, %v967_v38  ;;  %v1076_v6 = vadd.f32 %v1068_v4, %v965_v18  ;;  %v1110_v39 = vmax.f32 %v1102_v11, 0.0  ;;  %v1112_v35 = vmax.f32 %v1104_v54, 0.0 }
 0x136   : > { %v966_v49 = vadd.f32 %v958_v43, %v2537_v24 }
 0x137   : > { %v1189_v28 = vadd.f32 %v1181_v1, %v1078_v17  ;;  %v1338_v21 = vpop.permute.xlu2 %1337  ;;  %v1187_v46 = vadd.f32 %v1179_v44, %v1076_v6  ;;  %v1277_v1 = vmul.f32 %v1244_v42, %v557_v10  ;;  %v1071_v10 = vmul.f32 %v2585_v34, %v1058_v19 }
 0x138   : > { %v1239_v53 = vpop.permute.xlu0 %1238  ;;  %v1249_v37 = vpop.permute.xlu1 %1248 }
 0x139   : > { %v1278_v57 = vmul.f32 %v1249_v37, %v558_v23  ;;  %v1276_v36 = vmul.f32 %v1239_v53, %v1219_v27  ;;  %v1214_v27 = vadd.f32 %v2660_v61, %v1206_v32  ;;  %v1290_v24 = vmul.f32 %v2608_v13, %v1277_v1 }
 0x13b   : > { %v1291_v58 = vmul.f32 %v2608_v13, %v1278_v57  ;;  %v1289_v8 = vmul.f32 %v2608_v13, %v1276_v36  ;;  %v1222_v3 = vmax.f32 %v1214_v27, 0.0 }
 0x13d   : > { %v1299_v23 = vadd.f32 %v1291_v58, %v1189_v28  ;;  %v1297_v17 = vadd.f32 %v1289_v8, %v1187_v46 }
 0x13f   : > { %v1311_v52 = vadd.f32 %v2622_v0, %v1299_v23  ;;  %v1309_v60 = vadd.f32 %v2622_v0, %v1297_v17 }
 0x140   : > { %v922_v55 = vpop.permute.xlu0 %921  ;;  %v1023_v29 = vpop.permute.xlu1 %1022 }
 0x141   : > { %v1319_v33 = vmax.f32 %v1311_v52, 0.0  ;;  %v1056_v25 = vmul.f32 %v1023_v29, %v999_v45  ;;  %v947_v38 = vmul.f32 %v922_v55, %v890_v62  ;;  %v1317_v61 = vmax.f32 %v1309_v60, 0.0 }
 0x143   : > { %v1360_v5 = vsel %vm1357_vm0, %v1319_v33, %v1338_v21  ;;  %v1069_v47 = vmul.f32 %v2585_v34, %v1056_v25  ;;  %v960_v57 = vmul.f32 %v2574_v14, %v947_v38 }
 0x144   : > { %1690 = vmatmul.msk.f32.vlgmr.msra.gmra.mxu1 %vm1378_vm1, %v1360_v5 }
 0x145   : > { %v1077_v16 = vadd.f32 %v1069_v47, %v966_v49  ;;  %v968_v58 = vadd.f32 %v960_v57, %v2489_v56 }
 0x147   : > { %v1079_v31 = vadd.f32 %v1071_v10, %v968_v58 }
 0x148   : > { %v1134_v53 = vpop.permute.xlu0 %1133  ;;  %v1144_v37 = vpop.permute.xlu1 %1143 }
 0x149   : > { %v1167_v15 = vmul.f32 %v1134_v53, %v1110_v39  ;;  %v1169_v28 = vmul.f32 %v1144_v37, %v1112_v35 }
 0x14b   : > { %v1180_v48 = vmul.f32 %v2597_v51, %v1167_v15  ;;  %v1182_v42 = vmul.f32 %v2597_v51, %v1169_v28 }
 0x14d   : > { %v1188_v12 = vadd.f32 %v1180_v48, %v1077_v16  ;;  %v1190_v23 = vadd.f32 %v1182_v42, %v1079_v31 }
 0x14f   : > { %v1298_v14 = vadd.f32 %v1290_v24, %v1188_v12 }
 0x150   : > { %v1254_v30 = vpop.permute.xlu0 %1253  ;;  %v1334_v26 = vpop.permute.xlu1 %1333 }
 0x151   : > { %v1279_v41 = vmul.f32 %v1254_v30, %v1222_v3  ;;  %v1358_v2 = vsel %vm1357_vm0, %v1317_v61, %v1334_v26  ;;  %v1310_v56 = vadd.f32 %v2622_v0, %v1298_v14 }
 0x152   : > { %1688 = vmatmul.msk.f32.vlgmr.msra.gmra.mxu0 %vm1378_vm1, %v1358_v2 }
 0x153   : > { %v1292_v7 = vmul.f32 %v2608_v13, %v1279_v41  ;;  %v1318_v63 = vmax.f32 %v1310_v56, 0.0  ;;  %v1786_v13 = vld [vmem:[%s2823_s7] ss:$0 sm:$0xff] }
 0x155   : > { %v1300_v20 = vadd.f32 %v1292_v7, %v1190_v23 }
 0x157   : > { %v1312_v34 = vadd.f32 %v2622_v0, %v1300_v20 }
 0x158   : > { %v1336_v9 = vpop.permute.xlu0 %1335  ;;  %v1340_v51 = vpop.permute.xlu1 %1339 }
 0x159   : > { %v1359_v18 = vsel %vm1357_vm0, %v1318_v63, %v1336_v9  ;;  %v1320_v36 = vmax.f32 %v1312_v34, 0.0 }
 0x15a   : > { %1689 = vmatmul.msk.f32.gmra.mxu0 %vm1378_vm1, %v1359_v18 }
 0x15b   : > { %v1361_v52 = vsel %vm1357_vm0, %v1320_v36, %v1340_v51 }
 0x15c   : > { %1691 = vmatmul.msk.f32.gmra.mxu1 %vm1378_vm1, %v1361_v52 }
 0x18f   : > { %v1432_v45 = vpop.f32.mrf.mxu2 }
 0x190   : > { %v1433_v21 = vadd.f32 %v1786_v13, %v1432_v45 }
 0x192   : > { %v1448_v4 = vmax.f32 %v1433_v21, 0.0 }
 0x194   : > { %1456 = vrot.lane.b32.xlu2 %v1448_v4, %s1856_s17 }
 0x1a5   : > { %v1438_v0 = vpop.f32.mrf.mxu3 }
 0x1a6   : > { %v1439_v22 = vadd.f32 %v1786_v13, %v1438_v0 }
 0x1a7   : > { %v1435_v55 = vpop.f32.mrf.mxu2 }
 0x1a8   : > { %v1450_v29 = vmax.f32 %v1439_v22, 0.0  ;;  %v1436_v44 = vadd.f32 %v1786_v13, %v1435_v55 }
 0x1aa   : > { %v1449_v62 = vmax.f32 %v1436_v44, 0.0  ;;  %1460 = vrot.lane.b32.xlu1 %v1450_v29, %s1856_s17 }
 0x1ac   : > { %1458 = vrot.lane.b32.xlu0 %v1449_v62, %s1856_s17 }
 0x1ad   : > { %v1441_v33 = vpop.f32.mrf.mxu3 }
 0x1ae   : > { %v1442_v11 = vadd.f32 %v1786_v13, %v1441_v33 }
 0x1b0   : > { %v1451_v59 = vmax.f32 %v1442_v11, 0.0 }
 0x1b2   : > { %1462 = vrot.lane.b32.xlu2 %v1451_v59, %s1856_s17 }
 0x1c1   : > { %v1426_v5 = vpop.f32.mrf.mxu1 }
 0x1c2   : > { %v1427_v17 = vadd.f32 %v1786_v13, %v1426_v5 }
 0x1c4   : > { %v1446_v35 = vmax.f32 %v1427_v17, 0.0 }
 0x1cf   : > { %v1420_v54 = vpop.f32.mrf.mxu0 }
 0x1d0   : > { %v1421_v40 = vadd.f32 %v1786_v13, %v1420_v54 }
 0x1d2   : > { %v1444_v6 = vmax.f32 %v1421_v40, 0.0 }
 0x1d7   : > { %v1423_v50 = vpop.f32.mrf.mxu0 }
 0x1d8   : > { %v1424_v47 = vadd.f32 %v1786_v13, %v1423_v50 }
 0x1d9   : > { %v1429_v43 = vpop.f32.mrf.mxu1 }
 0x1da   : > { %v1430_v46 = vadd.f32 %v1786_v13, %v1429_v43  ;;  %v1445_v53 = vmax.f32 %v1424_v47, 0.0 }
 0x1dc   : > { %v1447_v38 = vmax.f32 %v1430_v46, 0.0 }
 0x1ee   : > { %v1457_v8 = vpop.permute.xlu2 %1456 }
 0x1ef   : > { %v1468_v25 = vsel %vm1378_vm1, %v1444_v6, %v1457_v8 }
 0x1f0   : > { %1472 = vst [vmem:[%s298_s22] sm:$0xff] %v1468_v25 }
 0x20c   : > { %v1463_v39 = vpop.permute.xlu2 %1462 }
 0x20d   : > { %v1471_v32 = vsel %vm1378_vm1, %v1447_v38, %v1463_v39 }
 0x20e   : > { %1475 = vst [vmem:[%s298_s22 + $0x18] sm:$0xff] %v1471_v32 }
 0x21c   : > { %v1461_v49 = vpop.permute.xlu1 %1460 }
 0x21d   : > { %v1470_v37 = vsel %vm1378_vm1, %v1446_v35, %v1461_v49 }
 0x21e   : > { %1474 = vst [vmem:[%s298_s22 + $0x10] sm:$0xff] %v1470_v37  ;;  %v1459_v1 = vpop.permute.xlu0 %1458 }
 0x21f   : > { %v1469_v57 = vsel %vm1378_vm1, %v1445_v53, %v1459_v1 }
 0x220   : > { %1473 = vst [vmem:[%s298_s22 + $0x8] sm:$0xff] %v1469_v57 }
 0x221   : > { %1817 = shalt.err (!%p1814_p3)
}
 0x222   : > { %s1857_s19 = smov 128   ;;  %s1858_s22 = smov 8  }
 0x223   : > { %1727 = dma.vmem_to_hbm [thread:$0]  (%p1942_p5), %s1490_s25, 512, %s1492_s26, %s1477_s9, %s1857_s19, %s1857_s19, %s1858_s22  }
 0x224 PF: > { %p1733_p4 = scmp.ge.s32.totalorder %s1852_s30, 2  ;;  %s1506_s24 = sand.u32 1, %s1840_s27  }
 0x225   : > { %s1507_s18 = scalar_lea.sflag [#allocation3], %s1506_s24 }
 0x226   : > { %p1730_p7 = pnand %p1733_p4, %p1946_p6 }
 0x228   : > { %p1731_p8 = pneg %p1730_p7 }
 0x22a   : > { %1835 = dma.done.wait (%p1731_p8), %s1507_s18, 512  }
 0x22b   : > { %1837 = vsyncadd (%p1731_p8), %s1507_s18, 4294966784  ;;  %p18_p9 = scmp.ge.s32.totalorder %s1929_s11, 4   ;;  %s2827_s27 = smov %s1844_s28 }
 0x22c   : > { %s2828_s28 = smov %s1848_s29  ;;  %s2829_s29 = smov %s1940_s14 }
 0x22d   : > { %s2830_s30 = smov %s1929_s11  ;;  %20 = sbr.rel (!%p18_p9) target bundleno = 3 (0x3), region = 108 }
 0x232   :  { %1513 = vsyncpa [#allocation3], 1 }
 0x233   :  { %1515 = vsyncpa [#allocation3 + $0x1], 1 }

</bundles_post_ra>
